<compile_context>
chip_gen: v7x
topology: tpu7x:2x2x1
jax: 0.10.0
libtpu: 0.0.40
codegen_flags: <defaults>
</compile_context>

<pallas_src>
import functools
import math

import jax
import jax.numpy as jnp
from jax.experimental import pallas as pl
from jax.experimental.pallas import tpu as pltpu


def choose_tile_n(C, weight_bytes_per_elem=2, vmem_weight_budget_bytes=48 << 20):
    """Largest column tile (multiple of 128 dividing C) whose double-buffered
    per-step weight stream (Wk/Wv/Wr tile + Wo tile) fits the VMEM budget.
    At the demo size (C=512) this returns C -> a single grid step."""
    assert C % 128 == 0, C
    best = 128
    tn = 128
    while tn <= C:
        bytes_per_step = 2 * (4 * C * tn) * weight_bytes_per_elem  # x2 double buffer
        if C % tn == 0 and bytes_per_step <= vmem_weight_budget_bytes:
            best = tn
        tn += 128
    return best


def prepare_timemix_params(params, tile_n=None, weight_dtype=jnp.bfloat16):
    """One-time parameter prep (hoisted out of the per-token decode loop):
    transpose to (in, out), cast to bf16, pre-tile Wk/Wv/Wr tile-major so each
    grid step's weight DMA is contiguous, precompute -exp(time_decay)."""
    C = params["key"].shape[1]
    if tile_n is None:
        tile_n = choose_tile_n(C, jnp.dtype(weight_dtype).itemsize)
    assert C % tile_n == 0 and tile_n % 128 == 0, (C, tile_n)
    n_tiles = C // tile_n
    f32 = jnp.float32

    # (3, C, C) in (in, out) layout, then tile-major: (n_tiles, 3, C, tile_n).
    w_kvr = jnp.stack(
        [params["key"].T, params["value"].T, params["receptance"].T]
    ).astype(weight_dtype)
    w_kvr_tiled = (
        w_kvr.reshape(3, C, n_tiles, tile_n).transpose(2, 0, 1, 3)
    )

    return {
        "w_kvr": w_kvr_tiled,                                # (nt, 3, C, TN)
        "w_o": params["output"].T.astype(weight_dtype),      # (C, C), (in, out)
        "time_mix": jnp.stack(
            [params["time_mix_k"].reshape(1, C),
             params["time_mix_v"].reshape(1, C),
             params["time_mix_r"].reshape(1, C)]).astype(f32),   # (3, 1, C)
        "time_first": params["time_first"].reshape(1, C).astype(f32),
        "neg_exp_time_decay":
            (-jnp.exp(params["time_decay"].astype(f32))).reshape(1, C),
    }


def rwkv_timemix_kernel(
    # inputs
    x_ref, sx_ref, state_ref, tmix_ref, tf_ref, ntd_ref, wkvr_ref, wo_ref,
    # outputs
    out_ref, nstate_ref,
    # scratch
    mix_ref,
):
    j = pl.program_id(1)   # column-tile index within this split (K-reduction axis)

    # Hoisted once per output block: token-shift mixing + bf16 cast, and the
    # zero-init of the resident output accumulator.
    @pl.when(j == 0)
    def _():
        x = x_ref[...]                       # (B_pad, C) f32
        sx = sx_ref[...]                     # (B_pad, C) f32
        tm = tmix_ref[...]                   # (3, 1, C)  f32
        mix_ref[...] = (x[None] * tm + sx[None] * (1.0 - tm)).astype(jnp.bfloat16)
        out_ref[...] = jnp.zeros_like(out_ref)

    xk = mix_ref[0]                          # (B_pad, C) bf16
    xv = mix_ref[1]
    xr = mix_ref[2]

    # Column tile of the three projections: bf16 x bf16 -> f32 accumulate (MXU).
    k = jnp.dot(xk, wkvr_ref[0], preferred_element_type=jnp.float32)
    v = jnp.dot(xv, wkvr_ref[1], preferred_element_type=jnp.float32)
    r = jax.nn.sigmoid(
        jnp.dot(xr, wkvr_ref[2], preferred_element_type=jnp.float32))

    sA = state_ref[0]                        # (B_pad, TN) f32
    sB = state_ref[1]
    sp = state_ref[2]
    tf = tf_ref[...]                         # (1, TN) time_first
    ntd = ntd_ref[...]                       # (1, TN) -exp(time_decay)

    # Numerically-stable per-channel WKV update (all f32).
    ww = tf + k
    p = jnp.maximum(sp, ww)
    e1 = jnp.exp(sp - p)
    e2 = jnp.exp(ww - p)
    a = e1 * sA + e2 * v
    b = e1 * sB + e2

    ww2 = sp + ntd
    p2 = jnp.maximum(ww2, k)
    e1b = jnp.exp(ww2 - p2)
    e2b = jnp.exp(k - p2)
    nstate_ref[0] = e1b * sA + e2b * v
    nstate_ref[1] = e1b * sB + e2b
    nstate_ref[2] = p2

    # Output projection: K-reduction over the column tiles of this split; the
    # (B_pad, C) output block is resident across j.  approx reciprocal -> EUP.
    rwkv = (r * a * pl.reciprocal(b, approx=True)).astype(jnp.bfloat16)
    out_ref[...] += jnp.dot(rwkv, wo_ref[...], preferred_element_type=jnp.float32)


def rwkv_timemix(x, state_A, state_B, state_p, state_x, prep, *,
                 num_column_splits=1):
    """Single-token RWKV TimeMix step. Returns (rwkv, new_A, new_B, new_p, new_x).

    num_column_splits: set to 2 on v7x (2 TensorCores / chip) with a tile_n
    <= C // 2; each core produces a partial output that is summed below.
    """
    B, C = x.shape
    f32 = jnp.float32

    n_tiles, three, C_w, tile_n = prep["w_kvr"].shape
    assert three == 3 and C_w == C and n_tiles * tile_n == C
    assert n_tiles % num_column_splits == 0, (n_tiles, num_column_splits)
    tiles_per_split = n_tiles // num_column_splits

    # Pad batch rows to a multiple of 8 (f32 sublanes). Padded rows inherit
    # zeros (incl. state_p = 0, not -1e30) -- mathematically benign, no
    # overflow, and they are sliced off below; never read the padded rows.
    B_pad = ((B + 7) // 8) * 8

    def pad_rows(a):
        a = a.astype(f32)
        return a if B_pad == B else jnp.pad(a, ((0, B_pad - B), (0, 0)))

    x_p = pad_rows(x)
    sx_p = pad_rows(state_x)
    state_stacked = jnp.stack(
        [pad_rows(state_A), pad_rows(state_B), pad_rows(state_p)])   # (3, B_pad, C)

    grid = (num_column_splits, tiles_per_split)

    def tile_idx(s, j):
        return s * tiles_per_split + j

    in_specs = [
        pl.BlockSpec((B_pad, C), lambda s, j: (0, 0)),                 # x
        pl.BlockSpec((B_pad, C), lambda s, j: (0, 0)),                 # state_x
        pl.BlockSpec((3, B_pad, tile_n),
                     lambda s, j: (0, 0, tile_idx(s, j))),             # stacked state
        pl.BlockSpec((3, 1, C), lambda s, j: (0, 0, 0)),               # time_mix_k/v/r
        pl.BlockSpec((1, tile_n), lambda s, j: (0, tile_idx(s, j))),   # time_first
        pl.BlockSpec((1, tile_n), lambda s, j: (0, tile_idx(s, j))),   # -exp(time_decay)
        pl.BlockSpec((None, 3, C, tile_n),
                     lambda s, j: (tile_idx(s, j), 0, 0, 0)),          # Wk/Wv/Wr tile
        pl.BlockSpec((tile_n, C), lambda s, j: (tile_idx(s, j), 0)),   # Wo (K-reduction)
    ]
    out_specs = (
        pl.BlockSpec((None, B_pad, C), lambda s, j: (s, 0, 0)),        # partial output
        pl.BlockSpec((3, B_pad, tile_n),
                     lambda s, j: (0, 0, tile_idx(s, j))),             # new state
    )
    out_shape = (
        jax.ShapeDtypeStruct((num_column_splits, B_pad, C), f32),
        jax.ShapeDtypeStruct((3, B_pad, C), f32),
    )

    weight_stream_bytes = 2 * (4 * C * tile_n) * prep["w_kvr"].dtype.itemsize
    vmem_limit = int(min(100 * 2 ** 20,
                         max(32 * 2 ** 20, weight_stream_bytes + 8 * 2 ** 20)))

    out_partial, nstate = pl.pallas_call(
        rwkv_timemix_kernel,
        grid=grid,
        in_specs=in_specs,
        out_specs=out_specs,
        out_shape=out_shape,
        scratch_shapes=[pltpu.VMEM((3, B_pad, C), jnp.bfloat16)],  # hoisted xk/xv/xr
        input_output_aliases={2: 1},   # stacked state_A/B/p -> new state (in place)
        compiler_params=pltpu.CompilerParams(
            dimension_semantics=("parallel", "arbitrary"),
            vmem_limit_bytes=vmem_limit),
    )(x_p, sx_p, state_stacked, prep["time_mix"], prep["time_first"],
      prep["neg_exp_time_decay"], prep["w_kvr"], prep["w_o"])

    out = jnp.sum(out_partial, axis=0)[:B]
    new_A = nstate[0, :B]
    new_B = nstate[1, :B]
    new_p = nstate[2, :B]
    # new_x is a pure identity of x: returned from the wrapper instead of
    # copying it through the kernel / HBM.
    return out, new_A, new_B, new_p, x


# ----------------------------- references ----------------------------------

def rwkv_timemix_ref_f32(x, sA, sB, sp, sx, params):
    """Pure-JAX f32 reference mirroring the PyTorch forward exactly."""
    C = x.shape[1]
    tmk = params["time_mix_k"].reshape(1, C)
    tmv = params["time_mix_v"].reshape(1, C)
    tmr = params["time_mix_r"].reshape(1, C)
    xk = x * tmk + sx * (1 - tmk)
    xv = x * tmv + sx * (1 - tmv)
    xr = x * tmr + sx * (1 - tmr)
    k = xk @ params["key"].T
    v = xv @ params["value"].T
    r = jax.nn.sigmoid(xr @ params["receptance"].T)
    ww = params["time_first"].reshape(1, C) + k
    p = jnp.maximum(sp, ww)
    e1 = jnp.exp(sp - p)
    e2 = jnp.exp(ww - p)
    a = e1 * sA + e2 * v
    b = e1 * sB + e2
    ww2 = sp - jnp.exp(params["time_decay"].reshape(1, C))
    p2 = jnp.maximum(ww2, k)
    e1b = jnp.exp(ww2 - p2)
    e2b = jnp.exp(k - p2)
    nA = e1b * sA + e2b * v
    nB = e1b * sB + e2b
    out = (r * a / b) @ params["output"].T
    return out, nA, nB, p2, x


def rwkv_timemix_ref_prepared(x, sA, sB, sp, sx, prep):
    """Reference mirroring the kernel's bf16-weight / f32-accumulate math."""
    bf16 = jnp.bfloat16
    nt, _, C, tn = prep["w_kvr"].shape
    w_kvr = prep["w_kvr"].transpose(1, 2, 0, 3).reshape(3, C, nt * tn)  # un-tile
    tmk, tmv, tmr = prep["time_mix"][0], prep["time_mix"][1], prep["time_mix"][2]
    xk = (x * tmk + sx * (1 - tmk)).astype(bf16)
    xv = (x * tmv + sx * (1 - tmv)).astype(bf16)
    xr = (x * tmr + sx * (1 - tmr)).astype(bf16)
    k = jnp.dot(xk, w_kvr[0], preferred_element_type=jnp.float32)
    v = jnp.dot(xv, w_kvr[1], preferred_element_type=jnp.float32)
    r = jax.nn.sigmoid(jnp.dot(xr, w_kvr[2], preferred_element_type=jnp.float32))
    ww = prep["time_first"] + k
    p = jnp.maximum(sp, ww)
    e1 = jnp.exp(sp - p)
    e2 = jnp.exp(ww - p)
    a = e1 * sA + e2 * v
    b = e1 * sB + e2
    ww2 = sp + prep["neg_exp_time_decay"]
    p2 = jnp.maximum(ww2, k)
    e1b = jnp.exp(ww2 - p2)
    e2b = jnp.exp(k - p2)
    nA = e1b * sA + e2b * v
    nB = e1b * sB + e2b
    rwkv = (r * a / b).astype(bf16)
    out = jnp.dot(rwkv, prep["w_o"], preferred_element_type=jnp.float32)
    return out, nA, nB, p2, x


if __name__ == "__main__":
    B = 2      # batch (single-token decode rows)
    C = 512    # n_embed (module default hidden_size)

    key = jax.random.PRNGKey(0)
    keys = jax.random.split(key, 12)
    scale = 1.0 / math.sqrt(C)
    params = {
        "time_decay": jax.random.normal(keys[0], (C,), jnp.float32) * 0.1,
        "time_first": jnp.full((C,), math.log(0.3), jnp.float32)
                      + 0.01 * jax.random.normal(keys[1], (C,), jnp.float32),
        "time_mix_k": jax.random.uniform(keys[2], (1, C), jnp.float32),
        "time_mix_v": jax.random.uniform(keys[3], (1, C), jnp.float32),
        "time_mix_r": jax.random.uniform(keys[4], (1, C), jnp.float32),
        "key":        jax.random.normal(keys[5], (C, C), jnp.float32) * scale,
        "value":      jax.random.normal(keys[6], (C, C), jnp.float32) * scale,
        "receptance": jax.random.normal(keys[7], (C, C), jnp.float32) * scale,
        "output":     jax.random.normal(keys[8], (C, C), jnp.float32) * scale,
    }

    x = jax.random.normal(keys[9], (B, C), jnp.float32)
    state_x = jax.random.normal(keys[10], (B, C), jnp.float32)
    state_A = jnp.zeros((B, C), jnp.float32)
    state_B = jnp.zeros((B, C), jnp.float32)
    state_p = jnp.full((B, C), -1e30, jnp.float32)

    # One-time parameter prep; at C=512 choose_tile_n picks tile_n = C (one step).
    prep = prepare_timemix_params(params)
    assert prep["w_kvr"].shape[0] == 1, prep["w_kvr"].shape  # single grid step here

    # References (computed before the kernel call; state buffers are aliased).
    ref_match = rwkv_timemix_ref_prepared(x, state_A, state_B, state_p, state_x, prep)
    ref_f32 = rwkv_timemix_ref_f32(x, state_A, state_B, state_p, state_x, params)

    step = jax.jit(functools.partial(rwkv_timemix, num_column_splits=1))
    outs = jax.block_until_ready(step(x, state_A, state_B, state_p, state_x, prep))

    # Check vs a reference using the same bf16 weights / f32 accumulation
    # (slightly looser than exact due to approx reciprocal -> bf16 cast).
    for o, rf in zip(outs, ref_match):
        assert o.shape == rf.shape and o.dtype == rf.dtype
        assert jnp.allclose(o, rf, rtol=1e-2, atol=1e-2), "mismatch vs matched ref"

    # Loose check vs the pure-f32 PyTorch-semantics reference
    # (difference is only bf16 weight quantization + approx reciprocal).
    for o, rf in zip(outs, ref_f32):
        assert jnp.allclose(o, rf, rtol=5e-2, atol=5e-2), "mismatch vs f32 ref"

    print("KERNEL_OK")
</pallas_src>

<mosaic_0001>
module attributes {stable_mosaic.version = 11 : i64} {
  func.func @rwkv_timemix_kernel(%arg0: i32, %arg1: i32, %arg2: memref<8x512xf32, #tpu.memory_space<vmem>>, %arg3: memref<8x512xf32, #tpu.memory_space<vmem>>, %arg4: memref<3x8x512xf32, #tpu.memory_space<vmem>>, %arg5: memref<3x1x512xf32, #tpu.memory_space<vmem>>, %arg6: memref<1x512xf32, #tpu.memory_space<vmem>>, %arg7: memref<1x512xf32, #tpu.memory_space<vmem>>, %arg8: memref<1x3x512x512xbf16, #tpu.memory_space<vmem>>, %arg9: memref<512x512xbf16, #tpu.memory_space<vmem>>, %arg10: memref<1x8x512xf32, #tpu.memory_space<vmem>>, %arg11: memref<3x8x512xf32, #tpu.memory_space<vmem>>, %arg12: memref<3x8x512xbf16, #tpu.memory_space<vmem>>) attributes {dimension_semantics = [#tpu.dimension_semantics<parallel>, #tpu.dimension_semantics<arbitrary>], iteration_bounds = array<i64: 1, 1>, scalar_prefetch = 0 : i64, scratch_operands = 1 : i64, tpu.core_type = #tpu.core_type<tc>, window_params = [{pipeline_mode = #tpu.pipeline_mode<synchronous>, transform_indices = @transform_0, window_bounds = array<i64: 8, 512>}, {pipeline_mode = #tpu.pipeline_mode<synchronous>, transform_indices = @transform_1, window_bounds = array<i64: 8, 512>}, {transform_indices = @transform_2, window_bounds = array<i64: 3, 8, 512>}, {pipeline_mode = #tpu.pipeline_mode<synchronous>, transform_indices = @transform_3, window_bounds = array<i64: 3, 1, 512>}, {transform_indices = @transform_4, window_bounds = array<i64: 1, 512>}, {transform_indices = @transform_5, window_bounds = array<i64: 1, 512>}, {transform_indices = @transform_6, window_bounds = array<i64: 1, 3, 512, 512>}, {transform_indices = @transform_7, window_bounds = array<i64: 512, 512>}, {transform_indices = @transform_8, window_bounds = array<i64: 1, 8, 512>}, {transform_indices = @transform_9, window_bounds = array<i64: 3, 8, 512>}]} {
    %c0_i32 = arith.constant 0 : i32
    %0 = arith.cmpi eq, %arg1, %c0_i32 : i32
    %1 = arith.extui %0 : i1 to i32
    %c0_i32_0 = arith.constant 0 : i32
    %2 = arith.cmpi ne, %1, %c0_i32_0 : i32
    scf.if %2 {
      %c0_53 = arith.constant 0 : index
      %c0_54 = arith.constant 0 : index
      %76 = vector.load %arg2[%c0_53, %c0_54] : memref<8x512xf32, #tpu.memory_space<vmem>>, vector<8x512xf32>
      %c0_55 = arith.constant 0 : index
      %c0_56 = arith.constant 0 : index
      %77 = vector.load %arg3[%c0_55, %c0_56] : memref<8x512xf32, #tpu.memory_space<vmem>>, vector<8x512xf32>
      %c0_57 = arith.constant 0 : index
      %c0_58 = arith.constant 0 : index
      %c0_59 = arith.constant 0 : index
      %78 = vector.load %arg5[%c0_57, %c0_58, %c0_59] : memref<3x1x512xf32, #tpu.memory_space<vmem>>, vector<3x1x512xf32>
      %79 = vector.shape_cast %76 : vector<8x512xf32> to vector<1x8x512xf32>
      %80 = vector.broadcast %79 : vector<1x8x512xf32> to vector<3x8x512xf32>
      %81 = vector.broadcast %78 : vector<3x1x512xf32> to vector<3x8x512xf32>
      %82 = arith.mulf %80, %81 : vector<3x8x512xf32>
      %83 = vector.shape_cast %77 : vector<8x512xf32> to vector<1x8x512xf32>
      %cst_60 = arith.constant 1.000000e+00 : f32
      %84 = vector.broadcast %cst_60 : f32 to vector<3x1x512xf32>
      %85 = arith.subf %84, %78 : vector<3x1x512xf32>
      %86 = vector.broadcast %83 : vector<1x8x512xf32> to vector<3x8x512xf32>
      %87 = vector.broadcast %85 : vector<3x1x512xf32> to vector<3x8x512xf32>
      %88 = arith.mulf %86, %87 : vector<3x8x512xf32>
      %89 = arith.addf %82, %88 : vector<3x8x512xf32>
      %90 = arith.truncf %89 : vector<3x8x512xf32> to vector<3x8x512xbf16>
      %c0_61 = arith.constant 0 : index
      %c0_62 = arith.constant 0 : index
      %c0_63 = arith.constant 0 : index
      %91 = vector.load %arg12[%c0_61, %c0_62, %c0_63] : memref<3x8x512xbf16, #tpu.memory_space<vmem>>, vector<3x8x512xbf16>
      tpu.vector_store %arg12[%c0_61, %c0_62, %c0_63], %90 {strides = array<i32>} : memref<3x8x512xbf16, #tpu.memory_space<vmem>>, vector<3x8x512xbf16>,
      %cst_64 = arith.constant 0.000000e+00 : f32
      %92 = vector.broadcast %cst_64 : f32 to vector<8x512xf32>
      %c0_65 = arith.constant 0 : index
      %c0_66 = arith.constant 0 : index
      %c0_67 = arith.constant 0 : index
      %93 = vector.load %arg10[%c0_65, %c0_66, %c0_67] : memref<1x8x512xf32, #tpu.memory_space<vmem>>, vector<1x8x512xf32>
      %94 = vector.shape_cast %93 : vector<1x8x512xf32> to vector<8x512xf32>
      %95 = vector.shape_cast %92 : vector<8x512xf32> to vector<1x8x512xf32>
      tpu.vector_store %arg10[%c0_65, %c0_66, %c0_67], %95 {strides = array<i32>} : memref<1x8x512xf32, #tpu.memory_space<vmem>>, vector<1x8x512xf32>,
    } else {
    }
    %c0 = arith.constant 0 : index
    %c0_1 = arith.constant 0 : index
    %c0_2 = arith.constant 0 : index
    %3 = vector.load %arg12[%c0, %c0_1, %c0_2] : memref<3x8x512xbf16, #tpu.memory_space<vmem>>, vector<1x8x512xbf16>
    %4 = vector.shape_cast %3 : vector<1x8x512xbf16> to vector<8x512xbf16>
    %c1 = arith.constant 1 : index
    %c0_3 = arith.constant 0 : index
    %c0_4 = arith.constant 0 : index
    %5 = vector.load %arg12[%c1, %c0_3, %c0_4] : memref<3x8x512xbf16, #tpu.memory_space<vmem>>, vector<1x8x512xbf16>
    %6 = vector.shape_cast %5 : vector<1x8x512xbf16> to vector<8x512xbf16>
    %c2 = arith.constant 2 : index
    %c0_5 = arith.constant 0 : index
    %c0_6 = arith.constant 0 : index
    %7 = vector.load %arg12[%c2, %c0_5, %c0_6] : memref<3x8x512xbf16, #tpu.memory_space<vmem>>, vector<1x8x512xbf16>
    %8 = vector.shape_cast %7 : vector<1x8x512xbf16> to vector<8x512xbf16>
    %c0_7 = arith.constant 0 : index
    %c0_8 = arith.constant 0 : index
    %c0_9 = arith.constant 0 : index
    %c0_10 = arith.constant 0 : index
    %9 = vector.load %arg8[%c0_7, %c0_8, %c0_9, %c0_10] : memref<1x3x512x512xbf16, #tpu.memory_space<vmem>>, vector<1x1x512x512xbf16>
    %10 = vector.shape_cast %9 : vector<1x1x512x512xbf16> to vector<512x512xbf16>
    %cst = arith.constant dense<0.000000e+00> : vector<8x512xf32>
    %11 = tpu.matmul %4, %10, %cst {dimension_numbers = #tpu.dot_dimension_numbers<[1], [0], [0], [1], [0, 0, 1, 1], [], []>} : vector<8x512xbf16>, vector<512x512xbf16>, vector<8x512xf32> -> vector<8x512xf32>
    %c0_11 = arith.constant 0 : index
    %c1_12 = arith.constant 1 : index
    %c0_13 = arith.constant 0 : index
    %c0_14 = arith.constant 0 : index
    %12 = vector.load %arg8[%c0_11, %c1_12, %c0_13, %c0_14] : memref<1x3x512x512xbf16, #tpu.memory_space<vmem>>, vector<1x1x512x512xbf16>
    %13 = vector.shape_cast %12 : vector<1x1x512x512xbf16> to vector<512x512xbf16>
    %cst_15 = arith.constant dense<0.000000e+00> : vector<8x512xf32>
    %14 = tpu.matmul %6, %13, %cst_15 {dimension_numbers = #tpu.dot_dimension_numbers<[1], [0], [0], [1], [0, 0, 1, 1], [], []>} : vector<8x512xbf16>, vector<512x512xbf16>, vector<8x512xf32> -> vector<8x512xf32>
    %c0_16 = arith.constant 0 : index
    %c2_17 = arith.constant 2 : index
    %c0_18 = arith.constant 0 : index
    %c0_19 = arith.constant 0 : index
    %15 = vector.load %arg8[%c0_16, %c2_17, %c0_18, %c0_19] : memref<1x3x512x512xbf16, #tpu.memory_space<vmem>>, vector<1x1x512x512xbf16>
    %16 = vector.shape_cast %15 : vector<1x1x512x512xbf16> to vector<512x512xbf16>
    %cst_20 = arith.constant dense<0.000000e+00> : vector<8x512xf32>
    %17 = tpu.matmul %8, %16, %cst_20 {dimension_numbers = #tpu.dot_dimension_numbers<[1], [0], [0], [1], [0, 0, 1, 1], [], []>} : vector<8x512xbf16>, vector<512x512xbf16>, vector<8x512xf32> -> vector<8x512xf32>
    %18 = arith.negf %17 : vector<8x512xf32>
    %19 = math.exp %18 : vector<8x512xf32>
    %cst_21 = arith.constant 1.000000e+00 : f32
    %20 = vector.broadcast %cst_21 : f32 to vector<8x512xf32>
    %21 = arith.addf %20, %19 : vector<8x512xf32>
    %22 = arith.divf %20, %21 : vector<8x512xf32>
    %c0_22 = arith.constant 0 : index
    %c0_23 = arith.constant 0 : index
    %c0_24 = arith.constant 0 : index
    %23 = vector.load %arg4[%c0_22, %c0_23, %c0_24] : memref<3x8x512xf32, #tpu.memory_space<vmem>>, vector<1x8x512xf32>
    %24 = vector.shape_cast %23 : vector<1x8x512xf32> to vector<8x512xf32>
    %c1_25 = arith.constant 1 : index
    %c0_26 = arith.constant 0 : index
    %c0_27 = arith.constant 0 : index
    %25 = vector.load %arg4[%c1_25, %c0_26, %c0_27] : memref<3x8x512xf32, #tpu.memory_space<vmem>>, vector<1x8x512xf32>
    %26 = vector.shape_cast %25 : vector<1x8x512xf32> to vector<8x512xf32>
    %c2_28 = arith.constant 2 : index
    %c0_29 = arith.constant 0 : index
    %c0_30 = arith.constant 0 : index
    %27 = vector.load %arg4[%c2_28, %c0_29, %c0_30] : memref<3x8x512xf32, #tpu.memory_space<vmem>>, vector<1x8x512xf32>
    %28 = vector.shape_cast %27 : vector<1x8x512xf32> to vector<8x512xf32>
    %c0_31 = arith.constant 0 : index
    %c0_32 = arith.constant 0 : index
    %29 = vector.load %arg6[%c0_31, %c0_32] : memref<1x512xf32, #tpu.memory_space<vmem>>, vector<1x512xf32>
    %c0_33 = arith.constant 0 : index
    %c0_34 = arith.constant 0 : index
    %30 = vector.load %arg7[%c0_33, %c0_34] : memref<1x512xf32, #tpu.memory_space<vmem>>, vector<1x512xf32>
    %31 = vector.broadcast %29 : vector<1x512xf32> to vector<8x512xf32>
    %32 = arith.addf %31, %11 : vector<8x512xf32>
    %33 = arith.maximumf %28, %32 : vector<8x512xf32>
    %34 = arith.subf %28, %33 : vector<8x512xf32>
    %35 = math.exp %34 : vector<8x512xf32>
    %36 = arith.subf %32, %33 : vector<8x512xf32>
    %37 = math.exp %36 : vector<8x512xf32>
    %38 = arith.mulf %35, %24 : vector<8x512xf32>
    %39 = arith.mulf %37, %14 : vector<8x512xf32>
    %40 = arith.addf %38, %39 : vector<8x512xf32>
    %41 = arith.mulf %35, %26 : vector<8x512xf32>
    %42 = arith.addf %41, %37 : vector<8x512xf32>
    %43 = vector.broadcast %30 : vector<1x512xf32> to vector<8x512xf32>
    %44 = arith.addf %28, %43 : vector<8x512xf32>
    %45 = arith.maximumf %44, %11 : vector<8x512xf32>
    %46 = arith.subf %44, %45 : vector<8x512xf32>
    %47 = math.exp %46 : vector<8x512xf32>
    %48 = arith.subf %11, %45 : vector<8x512xf32>
    %49 = math.exp %48 : vector<8x512xf32>
    %50 = arith.mulf %47, %24 : vector<8x512xf32>
    %51 = arith.mulf %49, %14 : vector<8x512xf32>
    %52 = arith.addf %50, %51 : vector<8x512xf32>
    %c0_35 = arith.constant 0 : index
    %c0_36 = arith.constant 0 : index
    %c0_37 = arith.constant 0 : index
    %53 = vector.load %arg11[%c0_35, %c0_36, %c0_37] : memref<3x8x512xf32, #tpu.memory_space<vmem>>, vector<1x8x512xf32>
    %54 = vector.shape_cast %53 : vector<1x8x512xf32> to vector<8x512xf32>
    %55 = vector.shape_cast %52 : vector<8x512xf32> to vector<1x8x512xf32>
    tpu.vector_store %arg11[%c0_35, %c0_36, %c0_37], %55 {strides = array<i32>} : memref<3x8x512xf32, #tpu.memory_space<vmem>>, vector<1x8x512xf32>,
    %56 = arith.mulf %47, %26 : vector<8x512xf32>
    %57 = arith.addf %56, %49 : vector<8x512xf32>
    %c1_38 = arith.constant 1 : index
    %c0_39 = arith.constant 0 : index
    %c0_40 = arith.constant 0 : index
    %58 = vector.load %arg11[%c1_38, %c0_39, %c0_40] : memref<3x8x512xf32, #tpu.memory_space<vmem>>, vector<1x8x512xf32>
    %59 = vector.shape_cast %58 : vector<1x8x512xf32> to vector<8x512xf32>
    %60 = vector.shape_cast %57 : vector<8x512xf32> to vector<1x8x512xf32>
    tpu.vector_store %arg11[%c1_38, %c0_39, %c0_40], %60 {strides = array<i32>} : memref<3x8x512xf32, #tpu.memory_space<vmem>>, vector<1x8x512xf32>,
    %c2_41 = arith.constant 2 : index
    %c0_42 = arith.constant 0 : index
    %c0_43 = arith.constant 0 : index
    %61 = vector.load %arg11[%c2_41, %c0_42, %c0_43] : memref<3x8x512xf32, #tpu.memory_space<vmem>>, vector<1x8x512xf32>
    %62 = vector.shape_cast %61 : vector<1x8x512xf32> to vector<8x512xf32>
    %63 = vector.shape_cast %45 : vector<8x512xf32> to vector<1x8x512xf32>
    tpu.vector_store %arg11[%c2_41, %c0_42, %c0_43], %63 {strides = array<i32>} : memref<3x8x512xf32, #tpu.memory_space<vmem>>, vector<1x8x512xf32>,
    %64 = arith.mulf %22, %40 : vector<8x512xf32>
    %65 = tpu.reciprocal %42 {approx = true} : vector<8x512xf32> -> vector<8x512xf32>
    %66 = arith.mulf %64, %65 : vector<8x512xf32>
    %67 = arith.truncf %66 : vector<8x512xf32> to vector<8x512xbf16>
    %c0_44 = arith.constant 0 : index
    %c0_45 = arith.constant 0 : index
    %c0_46 = arith.constant 0 : index
    %68 = vector.load %arg10[%c0_44, %c0_45, %c0_46] : memref<1x8x512xf32, #tpu.memory_space<vmem>>, vector<1x8x512xf32>
    %69 = vector.shape_cast %68 : vector<1x8x512xf32> to vector<8x512xf32>
    %c0_47 = arith.constant 0 : index
    %c0_48 = arith.constant 0 : index
    %70 = vector.load %arg9[%c0_47, %c0_48] : memref<512x512xbf16, #tpu.memory_space<vmem>>, vector<512x512xbf16>
    %cst_49 = arith.constant dense<0.000000e+00> : vector<8x512xf32>
    %71 = tpu.matmul %67, %70, %cst_49 {dimension_numbers = #tpu.dot_dimension_numbers<[1], [0], [0], [1], [0, 0, 1, 1], [], []>} : vector<8x512xbf16>, vector<512x512xbf16>, vector<8x512xf32> -> vector<8x512xf32>
    %72 = arith.addf %69, %71 : vector<8x512xf32>
    %c0_50 = arith.constant 0 : index
    %c0_51 = arith.constant 0 : index
    %c0_52 = arith.constant 0 : index
    %73 = vector.load %arg10[%c0_50, %c0_51, %c0_52] : memref<1x8x512xf32, #tpu.memory_space<vmem>>, vector<1x8x512xf32>
    %74 = vector.shape_cast %73 : vector<1x8x512xf32> to vector<8x512xf32>
    %75 = vector.shape_cast %72 : vector<8x512xf32> to vector<1x8x512xf32>
    tpu.vector_store %arg10[%c0_50, %c0_51, %c0_52], %75 {strides = array<i32>} : memref<1x8x512xf32, #tpu.memory_space<vmem>>, vector<1x8x512xf32>,
    return
  }
  func.func @transform_0(%arg0: i32, %arg1: i32) -> (i32, i32) {
    %c0_i32 = arith.constant 0 : i32
    %c0_i32_0 = arith.constant 0 : i32
    %c0_i32_1 = arith.constant 0 : i32
    return %c0_i32, %c0_i32_0 : i32, i32
  }
  func.func @transform_1(%arg0: i32, %arg1: i32) -> (i32, i32) {
    %c0_i32 = arith.constant 0 : i32
    %c0_i32_0 = arith.constant 0 : i32
    %c0_i32_1 = arith.constant 0 : i32
    return %c0_i32, %c0_i32_0 : i32, i32
  }
  func.func @transform_2(%arg0: i32, %arg1: i32) -> (i32, i32, i32) {
    %c1_i32 = arith.constant 1 : i32
    %0 = arith.muli %arg0, %c1_i32 : i32
    %1 = arith.addi %0, %arg1 : i32
    %c0_i32 = arith.constant 0 : i32
    %c0_i32_0 = arith.constant 0 : i32
    %c0_i32_1 = arith.constant 0 : i32
    return %c0_i32, %c0_i32_0, %1 : i32, i32, i32
  }
  func.func @transform_3(%arg0: i32, %arg1: i32) -> (i32, i32, i32) {
    %c0_i32 = arith.constant 0 : i32
    %c0_i32_0 = arith.constant 0 : i32
    %c0_i32_1 = arith.constant 0 : i32
    %c0_i32_2 = arith.constant 0 : i32
    return %c0_i32, %c0_i32_0, %c0_i32_1 : i32, i32, i32
  }
  func.func @transform_4(%arg0: i32, %arg1: i32) -> (i32, i32) {
    %c1_i32 = arith.constant 1 : i32
    %0 = arith.muli %arg0, %c1_i32 : i32
    %1 = arith.addi %0, %arg1 : i32
    %c0_i32 = arith.constant 0 : i32
    %c0_i32_0 = arith.constant 0 : i32
    return %c0_i32, %1 : i32, i32
  }
  func.func @transform_5(%arg0: i32, %arg1: i32) -> (i32, i32) {
    %c1_i32 = arith.constant 1 : i32
    %0 = arith.muli %arg0, %c1_i32 : i32
    %1 = arith.addi %0, %arg1 : i32
    %c0_i32 = arith.constant 0 : i32
    %c0_i32_0 = arith.constant 0 : i32
    return %c0_i32, %1 : i32, i32
  }
  func.func @transform_6(%arg0: i32, %arg1: i32) -> (i32, i32, i32, i32) {
    %c1_i32 = arith.constant 1 : i32
    %0 = arith.muli %arg0, %c1_i32 : i32
    %1 = arith.addi %0, %arg1 : i32
    %c0_i32 = arith.constant 0 : i32
    %c0_i32_0 = arith.constant 0 : i32
    %c0_i32_1 = arith.constant 0 : i32
    %c0_i32_2 = arith.constant 0 : i32
    return %1, %c0_i32, %c0_i32_0, %c0_i32_1 : i32, i32, i32, i32
  }
  func.func @transform_7(%arg0: i32, %arg1: i32) -> (i32, i32) {
    %c1_i32 = arith.constant 1 : i32
    %0 = arith.muli %arg0, %c1_i32 : i32
    %1 = arith.addi %0, %arg1 : i32
    %c0_i32 = arith.constant 0 : i32
    %c0_i32_0 = arith.constant 0 : i32
    return %1, %c0_i32 : i32, i32
  }
  func.func @transform_8(%arg0: i32, %arg1: i32) -> (i32, i32, i32) {
    %c0_i32 = arith.constant 0 : i32
    %c0_i32_0 = arith.constant 0 : i32
    %c0_i32_1 = arith.constant 0 : i32
    return %arg0, %c0_i32, %c0_i32_0 : i32, i32, i32
  }
  func.func @transform_9(%arg0: i32, %arg1: i32) -> (i32, i32, i32) {
    %c1_i32 = arith.constant 1 : i32
    %0 = arith.muli %arg0, %c1_i32 : i32
    %1 = arith.addi %0, %arg1 : i32
    %c0_i32 = arith.constant 0 : i32
    %c0_i32_0 = arith.constant 0 : i32
    %c0_i32_1 = arith.constant 0 : i32
    return %c0_i32, %c0_i32_0, %1 : i32, i32, i32
  }
}

</mosaic_0001>

<bundles_post_ra>
// kernel: rwkv_timemix.1
= control target key start
LH: loop header
LB: loop body
LE: loop exit
PB: predicated region body
PF: predicated region fallthrough
CT: control target
= control target key end

     0   :  { %15 = vsyncpa [#allocation4], 0  ;;  %s6550_s0 = inlined_call_operand.vmem [shape: f32[8,512], index: 0, kind: input, shape index: {}]   ;;  %s6551_s1 = inlined_call_operand.vmem [shape: f32[8,512], index: 1, kind: input, shape index: {}]   ;;  %s6552_s2 = inlined_call_operand.vmem [shape: f32[3,8,512], index: 2, kind: input, shape index: {}, may-alias: {2,9}]   ;;  %s6553_s3 = inlined_call_operand.hbm [shape: f32[3,1,512], index: 3, kind: input, shape index: {}]   ;;  %s6554_s4 = inlined_call_operand.hbm [shape: f32[1,512], index: 4, kind: input, shape index: {}]   ;;  %s6555_s5 = inlined_call_operand.hbm [shape: f32[1,512], index: 5, kind: input, shape index: {}]   ;;  %s6556_s6 = inlined_call_operand.hbm [shape: bf16[1,3,512,512], index: 6, kind: input, shape index: {}]   ;;  %s6557_s7 = inlined_call_operand.hbm [shape: bf16[512,512], index: 7, kind: input, shape index: {}]   ;;  %s6558_s8 = inlined_call_operand.vmem [shape: f32[1,8,512], index: 8, kind: output, shape index: {0}]   ;;  %s6559_s9 = inlined_call_operand.vmem [shape: f32[3,8,512], index: 9, kind: output, shape index: {1}, may-alias: {2,9}]  }
   0x1   :  { %16 = vsyncpa [#allocation6], 0 }
   0x2   :  { %17 = vsyncpa [#allocation9], 0  ;;  %s5991_s30 = smov [#allocation5]   ;;  %s5992_s11 = smov [#allocation8]  }
   0x3   :  { %s54_s10 = sshll.u32 %s5991_s30, 4  ;;  %s81_s12 = sshll.u32 %s5992_s11, 4  ;;  %s55_s10 = int_to_ptr.vmem [resolvable:$true] %s54_s10  ;;  %s6050_s12 = int_to_ptr.vmem [resolvable:$true] %s81_s12 }
   0x4   :  { %s5875_s15 = scalar_lea.hbm %s6554_s4, 64 }
   0x5   :  { %p5876_p0 = scmp.ne.s32.totalorder %s6554_s4, %s5875_s15  ;;  %p5879_p1 = scmp.lt.u32.totalorder %s5875_s15, %s6554_s4 }
   0x7   :  { %p5881_p2 = pnand %p5879_p1, %p5876_p0 }
   0x9   :  { %5884 = shalt.err (!%p5881_p2)
}
   0xa   :  { %s5885_s20 = scalar_lea.vmem %s55_s10, 64  ;;  %p5890_p4 = scmp.lt.s32.totalorder %s55_s10, %s55_s10 }
   0xb   :  { %p5886_p3 = scmp.ne.s32.totalorder %s55_s10, %s5885_s20  ;;  %p5891_p5 = scmp.lt.s32.totalorder %s5885_s20, %s5885_s20 }
   0xd   :  { %p5892_p6 = por %p5891_p5, %p5890_p4 }
   0xf   :  { %p5893_p7 = pnand %p5892_p6, %p5886_p3 }
  0x11   :  { %5896 = shalt.err (!%p5893_p7)
}
  0x12   :  { %57 = dma.hbm_to_vmem [thread:$0]  %s6554_s4, 64, %s55_s10, [#allocation6]  }
  0x13   :  { %s5897_s25 = scalar_lea.hbm %s6556_s6, 49152 }
  0x14   :  { %p5898_p8 = scmp.ne.s32.totalorder %s6556_s6, %s5897_s25  ;;  %p5901_p9 = scmp.lt.u32.totalorder %s5897_s25, %s6556_s6 }
  0x16   :  { %p5903_p10 = pnand %p5901_p9, %p5898_p8 }
  0x18   :  { %5906 = shalt.err (!%p5903_p10)
}
  0x19   :  { %s5907_s30 = scalar_lea.vmem %s6050_s12, 49152  ;;  %p5912_p12 = scmp.lt.s32.totalorder %s6050_s12, %s6050_s12 }
  0x1a   :  { %p5908_p11 = scmp.ne.s32.totalorder %s6050_s12, %s5907_s30  ;;  %p5913_p13 = scmp.lt.s32.totalorder %s5907_s30, %s5907_s30 }
  0x1c   :  { %p5914_p0 = por %p5913_p13, %p5912_p12 }
  0x1e   :  { %p5915_p1 = pnand %p5914_p0, %p5908_p11 }
  0x20   :  { %5918 = shalt.err (!%p5915_p1)
}
  0x21   :  { %s5993_s4 = smov 256   ;;  %s5994_s10 = smov 16  }
  0x22   :  { %87 = dma.hbm_to_vmem [thread:$0]  %s6556_s6, 49152, %s6050_s12, [#allocation9], %s5993_s4, %s5993_s4, %s5994_s10  }
  0x23   :  { %s5995_s14 = smov [#allocation3]   ;;  %s5919_s18 = scalar_lea.hbm %s6553_s3, 192 }
  0x24   :  { %s37_s15 = sshll.u32 %s5995_s14, 4  ;;  %p5920_p2 = scmp.ne.s32.totalorder %s6553_s3, %s5919_s18  ;;  %s38_s15 = int_to_ptr.vmem [resolvable:$true] %s37_s15 }
  0x25   :  { %p5923_p3 = scmp.lt.u32.totalorder %s5919_s18, %s6553_s3 }
  0x27   :  { %p5925_p4 = pnand %p5923_p3, %p5920_p2 }
  0x29   :  { %5928 = shalt.err (!%p5925_p4)
}
  0x2a   :  { %s5929_s23 = scalar_lea.vmem %s38_s15, 192  ;;  %p5934_p6 = scmp.lt.s32.totalorder %s38_s15, %s38_s15 }
  0x2b   :  { %p5930_p5 = scmp.ne.s32.totalorder %s38_s15, %s5929_s23  ;;  %p5935_p7 = scmp.lt.s32.totalorder %s5929_s23, %s5929_s23 }
  0x2d   :  { %p5936_p8 = por %p5935_p7, %p5934_p6 }
  0x2f   :  { %p5937_p9 = pnand %p5936_p8, %p5930_p5 }
  0x31   :  { %5940 = shalt.err (!%p5937_p9)
}
  0x32   :  { %s5996_s6 = smov 64   ;;  %s5997_s12 = smov 4  }
  0x33   :  { %43 = dma.hbm_to_vmem [thread:$0]  %s6553_s3, 192, %s38_s15, [#allocation4], %s5996_s6, %s5996_s6, %s5997_s12  }
  0x34   :  { %s5998_s26 = smov [#allocation7]   ;;  %s5999_s28 = smov [#allocation10]  }
  0x35   :  { %s68_s27 = sshll.u32 %s5998_s26, 4  ;;  %s98_s29 = sshll.u32 %s5999_s28, 4  ;;  %s69_s27 = int_to_ptr.vmem [resolvable:$true] %s68_s27  ;;  %s99_s29 = int_to_ptr.vmem [resolvable:$true] %s98_s29 }
  0x36   :  { %s5941_s13 = scalar_lea.hbm %s6555_s5, 64 }
  0x37   :  { %p5942_p10 = scmp.ne.s32.totalorder %s6555_s5, %s5941_s13  ;;  %p5945_p11 = scmp.lt.u32.totalorder %s5941_s13, %s6555_s5 }
  0x39   :  { %p5947_p12 = pnand %p5945_p11, %p5942_p10 }
  0x3b   :  { %5950 = shalt.err (!%p5947_p12)
}
  0x3c   :  { %s5951_s3 = scalar_lea.vmem %s69_s27, 64  ;;  %p5956_p0 = scmp.lt.s32.totalorder %s69_s27, %s69_s27 }
  0x3d   :  { %p5952_p13 = scmp.ne.s32.totalorder %s69_s27, %s5951_s3  ;;  %p5957_p1 = scmp.lt.s32.totalorder %s5951_s3, %s5951_s3 }
  0x3f   :  { %p5958_p2 = por %p5957_p1, %p5956_p0 }
  0x41   :  { %p5959_p3 = pnand %p5958_p2, %p5952_p13 }
  0x43   :  { %5962 = shalt.err (!%p5959_p3)
}
  0x44   :  { %71 = dma.hbm_to_vmem [thread:$0]  %s6555_s5, 64, %s69_s27, [#allocation6]  }
  0x45   :  { %s5963_s22 = scalar_lea.hbm %s6557_s7, 16384 }
  0x46   :  { %p5964_p4 = scmp.ne.s32.totalorder %s6557_s7, %s5963_s22  ;;  %p5967_p5 = scmp.lt.u32.totalorder %s5963_s22, %s6557_s7 }
  0x48   :  { %p5969_p6 = pnand %p5967_p5, %p5964_p4 }
  0x4a   :  { %5972 = shalt.err (!%p5969_p6)
}
  0x4b   :  { %s5973_s25 = scalar_lea.vmem %s99_s29, 16384  ;;  %p5978_p8 = scmp.lt.s32.totalorder %s99_s29, %s99_s29 }
  0x4c   :  { %p5974_p7 = scmp.ne.s32.totalorder %s99_s29, %s5973_s25  ;;  %p5979_p9 = scmp.lt.s32.totalorder %s5973_s25, %s5973_s25 }
  0x4e   :  { %p5980_p10 = por %p5979_p9, %p5978_p8 }
  0x50   :  { %p5981_p11 = pnand %p5980_p10, %p5974_p7 }
  0x52   :  { %5984 = shalt.err (!%p5981_p11)
}
  0x53   :  { %104 = dma.hbm_to_vmem [thread:$0]  %s6557_s7, 16384, %s99_s29, [#allocation9], %s5993_s4, %s5993_s4, %s5994_s10  }
  0x54   :  { %5985 = dma.done.wait [#allocation4], 192  }
  0x55   :  { %5986 = vsyncadd [#allocation4], 4294967104 }
  0x56   :  { %5987 = dma.done.wait [#allocation6], 128  }
  0x57   :  { %5988 = vsyncadd [#allocation6], 4294967168 }
  0x58   :  { %5989 = dma.done.wait [#allocation9], 65536  }
  0x59   :  { %5990 = vsyncadd [#allocation9], 4294901760  ;;  %v5042_v0 = vld [vmem:[#allocation8 + $0x4] ss:$16 sps:$4 sm:$0xff]   ;;  %v5044_v1 = vld [vmem:[#allocation8 + $0xc] ss:$16 sps:$4 sm:$0xff]   ;;  %v173_v37 = vlaneseq }
  0x5a   :  { %1183 = vmatprep.subr.bf16.mxu0 %v5042_v0  ;;  %v5046_v2 = vld [vmem:[#allocation8] ss:$16 sps:$4 sm:$0xff]   ;;  %v5047_v3 = vld [vmem:[#allocation8 + $0x8] ss:$16 sps:$4 sm:$0xff]   ;;  %1265 = vmatprep.subr.bf16.mxu1 %v5044_v1  ;;  %v5048_v4 = vld [vmem:[#allocation8 + $0x24] ss:$16 sps:$4 sm:$0xff]  }
  0x5b   :  { %1184 = vmatpush1.bf16.msra.mxu0 %v5046_v2  ;;  %1266 = vmatpush1.bf16.msra.mxu1 %v5047_v3  ;;  %v5050_v5 = vld [vmem:[#allocation8 + $0x2c] ss:$16 sps:$4 sm:$0xff]   ;;  %v5052_v6 = vld [vmem:[#allocation8 + $0x20] ss:$16 sps:$4 sm:$0xff]   ;;  %v5053_v7 = vld [vmem:[#allocation8 + $0x28] ss:$16 sps:$4 sm:$0xff]  }
  0x5c   :  { %1185 = vmatprep.subr.bf16.mxu0 %v5048_v4  ;;  %1267 = vmatprep.subr.bf16.mxu1 %v5050_v5  ;;  %v5054_v8 = vld [vmem:[#allocation8 + $0x44] ss:$16 sps:$4 sm:$0xff]   ;;  %v5056_v9 = vld [vmem:[#allocation8 + $0x4c] ss:$16 sps:$4 sm:$0xff]   ;;  %v5058_v10 = vld [vmem:[#allocation8 + $0x40] ss:$16 sps:$4 sm:$0xff]  }
  0x5d   :  { %v5059_v11 = vld [vmem:[#allocation8 + $0x48] ss:$16 sps:$4 sm:$0xff]   ;;  %v5060_v12 = vld [vmem:[#allocation8 + $0x64] ss:$16 sps:$4 sm:$0xff]   ;;  %v5062_v13 = vld [vmem:[#allocation8 + $0x6c] ss:$16 sps:$4 sm:$0xff]  }
  0x5e   :  { %v5064_v14 = vld [vmem:[#allocation8 + $0x60] ss:$16 sps:$4 sm:$0xff]   ;;  %v5065_v15 = vld [vmem:[#allocation8 + $0x68] ss:$16 sps:$4 sm:$0xff]   ;;  %v5066_v16 = vld [vmem:[#allocation8 + $0x84] ss:$16 sps:$4 sm:$0xff]  }
  0x5f   :  { %1186 = vmatpush1.bf16.msra.mxu0 %v5052_v6  ;;  %1268 = vmatpush1.bf16.msra.mxu1 %v5053_v7  ;;  %v5068_v17 = vld [vmem:[#allocation8 + $0x8c] ss:$16 sps:$4 sm:$0xff]   ;;  %v5070_v18 = vld [vmem:[#allocation8 + $0x80] ss:$16 sps:$4 sm:$0xff]   ;;  %v5071_v19 = vld [vmem:[#allocation8 + $0x88] ss:$16 sps:$4 sm:$0xff]  }
  0x60   :  { %1187 = vmatprep.subr.bf16.mxu0 %v5054_v8  ;;  %1269 = vmatprep.subr.bf16.mxu1 %v5056_v9  ;;  %v5072_v20 = vld [vmem:[#allocation8 + $0xa4] ss:$16 sps:$4 sm:$0xff]   ;;  %v5074_v21 = vld [vmem:[#allocation8 + $0xac] ss:$16 sps:$4 sm:$0xff]   ;;  %v5076_v22 = vld [vmem:[#allocation8 + $0xa0] ss:$16 sps:$4 sm:$0xff]  }
  0x61   :  { %v5077_v23 = vld [vmem:[#allocation8 + $0xa8] ss:$16 sps:$4 sm:$0xff]   ;;  %v5078_v24 = vld [vmem:[#allocation8 + $0xc4] ss:$16 sps:$4 sm:$0xff]   ;;  %v5080_v25 = vld [vmem:[#allocation8 + $0xcc] ss:$16 sps:$4 sm:$0xff]  }
  0x62   :  { %v5082_v26 = vld [vmem:[#allocation8 + $0xc0] ss:$16 sps:$4 sm:$0xff]   ;;  %v5083_v27 = vld [vmem:[#allocation8 + $0xc8] ss:$16 sps:$4 sm:$0xff]   ;;  %v5084_v28 = vld [vmem:[#allocation8 + $0xe4] ss:$16 sps:$4 sm:$0xff]  }
  0x63   :  { %1188 = vmatpush1.bf16.msra.mxu0 %v5058_v10  ;;  %1270 = vmatpush1.bf16.msra.mxu1 %v5059_v11  ;;  %v5086_v29 = vld [vmem:[#allocation8 + $0xec] ss:$16 sps:$4 sm:$0xff]   ;;  %v5088_v30 = vld [vmem:[#allocation8 + $0xe0] ss:$16 sps:$4 sm:$0xff]   ;;  %v5089_v31 = vld [vmem:[#allocation8 + $0xe8] ss:$16 sps:$4 sm:$0xff]  }
  0x64   :  { %1189 = vmatprep.subr.bf16.mxu0 %v5060_v12  ;;  %1271 = vmatprep.subr.bf16.mxu1 %v5062_v13  ;;  %v5090_v32 = vld [vmem:[#allocation8 + $0x104] ss:$16 sps:$4 sm:$0xff]   ;;  %v5092_v33 = vld [vmem:[#allocation8 + $0x10c] ss:$16 sps:$4 sm:$0xff]   ;;  %v5094_v34 = vld [vmem:[#allocation8 + $0x100] ss:$16 sps:$4 sm:$0xff]  }
  0x65   :  { %v5095_v35 = vld [vmem:[#allocation8 + $0x108] ss:$16 sps:$4 sm:$0xff]   ;;  %v5096_v36 = vld [vmem:[#allocation8 + $0x124] ss:$16 sps:$4 sm:$0xff]   ;;  %v5098_v38 = vld [vmem:[#allocation8 + $0x12c] ss:$16 sps:$4 sm:$0xff]  }
  0x66   :  { %v5100_v39 = vld [vmem:[#allocation8 + $0x120] ss:$16 sps:$4 sm:$0xff]   ;;  %v5101_v40 = vld [vmem:[#allocation8 + $0x128] ss:$16 sps:$4 sm:$0xff]   ;;  %v5102_v41 = vld [vmem:[#allocation8 + $0x144] ss:$16 sps:$4 sm:$0xff]  }
  0x67   :  { %1190 = vmatpush1.bf16.msra.mxu0 %v5064_v14  ;;  %1272 = vmatpush1.bf16.msra.mxu1 %v5065_v15  ;;  %v6123_v42 = vshrl.u32 %v173_v37, 7  ;;  %v5104_v43 = vld [vmem:[#allocation8 + $0x14c] ss:$16 sps:$4 sm:$0xff]   ;;  %v5106_v44 = vld [vmem:[#allocation8 + $0x140] ss:$16 sps:$4 sm:$0xff]   ;;  %v6131_v51 = vld [vmem:[%s6550_s0 + $0x8] sm:$0xff] }
  0x68   :  { %1191 = vmatprep.subr.bf16.mxu0 %v5066_v16  ;;  %1273 = vmatprep.subr.bf16.mxu1 %v5068_v17  ;;  %v5107_v45 = vld [vmem:[#allocation8 + $0x148] ss:$16 sps:$4 sm:$0xff]   ;;  %v5108_v46 = vld [vmem:[#allocation8 + $0x164] ss:$16 sps:$4 sm:$0xff]   ;;  %v5110_v48 = vld [vmem:[#allocation8 + $0x16c] ss:$16 sps:$4 sm:$0xff]  }
  0x69   :  { %v6126_v47 = vsub.s32 1, %v6123_v42  ;;  %v5112_v49 = vld [vmem:[#allocation8 + $0x160] ss:$16 sps:$4 sm:$0xff]   ;;  %v5113_v50 = vld [vmem:[#allocation8 + $0x168] ss:$16 sps:$4 sm:$0xff]   ;;  %v6149_v61 = vsub.s32 0, %v6123_v42 }
  0x6a   :  { %v6133_v52 = vld [vmem:[#allocation3] sm:$0xf]  ;;  %v5114_v53 = vld [vmem:[#allocation8 + $0x184] ss:$16 sps:$4 sm:$0xff]   ;;  %v5118_v60 = vld [vmem:[#allocation8 + $0x180] ss:$16 sps:$4 sm:$0xff]  }
  0x6b   :  { %1192 = vmatpush1.bf16.msra.mxu0 %v5070_v18  ;;  %1274 = vmatpush1.bf16.msra.mxu1 %v5071_v19  ;;  %v5116_v54 = vld [vmem:[#allocation8 + $0x18c] ss:$16 sps:$4 sm:$0xff]   ;;  %v180_v55 = vrot.slane %v6133_v52, %v6126_v47  ;;  %v6138_v56 = vsub.f32 1.0, %v6133_v52  ;;  %v6143_v57 = vld [vmem:[%s6551_s1 + $0x8] sm:$0xff]  ;;  %v5124_v2 = vld [vmem:[#allocation8 + $0x1a0] ss:$16 sps:$4 sm:$0xff]   ;;  %v176_v6 = vrot.slane %v6133_v52, %v6149_v61 }
  0x6c   :  { %1193 = vmatprep.subr.bf16.mxu0 %v5072_v20  ;;  %1275 = vmatprep.subr.bf16.mxu1 %v5074_v21  ;;  %v5119_v62 = vld [vmem:[#allocation8 + $0x188] ss:$16 sps:$4 sm:$0xff]   ;;  %v5120_v0 = vld [vmem:[#allocation8 + $0x1a4] ss:$16 sps:$4 sm:$0xff]   ;;  %v5122_v1 = vld [vmem:[#allocation8 + $0x1ac] ss:$16 sps:$4 sm:$0xff]  }
  0x6d   :  { %v234_v58 = vmul.f32 %v180_v55, %v6131_v51  ;;  %v258_v59 = vrot.slane %v6138_v56, %v6126_v47  ;;  %v5125_v3 = vld [vmem:[#allocation8 + $0x1a8] ss:$16 sps:$4 sm:$0xff]   ;;  %v159_v5 = vld [vmem:[%s6550_s0] sm:$0xff]  ;;  %v254_v7 = vrot.slane %v6138_v56, %v6149_v61  ;;  %v5126_v10 = vld [vmem:[#allocation8 + $0x1c4] ss:$16 sps:$4 sm:$0xff]  }
  0x6e   :  { %v6162_v9 = vld [vmem:[%s6551_s1] sm:$0xff]  ;;  %v233_v13 = vmul.f32 %v176_v6, %v159_v5  ;;  %v5131_v15 = vld [vmem:[#allocation8 + $0x1c8] ss:$16 sps:$4 sm:$0xff]   ;;  %v5132_v16 = vld [vmem:[#allocation8 + $0x1e4] ss:$16 sps:$4 sm:$0xff]  }
  0x6f   :  { %1194 = vmatpush1.bf16.msra.mxu0 %v5076_v22  ;;  %1276 = vmatpush1.bf16.msra.mxu1 %v5077_v23  ;;  %v312_v63 = vmul.f32 %v258_v59, %v6143_v57  ;;  %v5128_v11 = vld [vmem:[#allocation8 + $0x1cc] ss:$16 sps:$4 sm:$0xff]   ;;  %v5130_v12 = vld [vmem:[#allocation8 + $0x1c0] ss:$16 sps:$4 sm:$0xff]   ;;  %v311_v14 = vmul.f32 %v254_v7, %v6162_v9  ;;  %v5137_v20 = vld [vmem:[#allocation8 + $0x1e8] ss:$16 sps:$4 sm:$0xff]  }
  0x70   :  { %1195 = vmatprep.subr.bf16.mxu0 %v5078_v24  ;;  %1277 = vmatprep.subr.bf16.mxu1 %v5080_v25  ;;  %v5134_v17 = vld [vmem:[#allocation8 + $0x1ec] ss:$16 sps:$4 sm:$0xff]   ;;  %v5136_v18 = vld [vmem:[#allocation8 + $0x1e0] ss:$16 sps:$4 sm:$0xff]   ;;  %v5140_v21 = vld [vmem:[#allocation8 + $0x204] ss:$16 sps:$4 sm:$0xff]  }
  0x71   :  { %v324_v4 = vadd.f32 %v312_v63, %v234_v58  ;;  %v323_v19 = vadd.f32 %v311_v14, %v233_v13  ;;  %v5143_v22 = vld [vmem:[#allocation8 + $0x20c] ss:$16 sps:$4 sm:$0xff]   ;;  %v5138_v23 = vld [vmem:[#allocation8 + $0x200] ss:$16 sps:$4 sm:$0xff]   ;;  %v5141_v25 = vld [vmem:[#allocation8 + $0x208] ss:$16 sps:$4 sm:$0xff]  }
  0x72   :  { %v5159_v37 = vld [vmem:[#allocation8 + $0x268] ss:$16 sps:$4 sm:$0xff]   ;;  %v5179_v55 = vld [vmem:[#allocation8 + $0x2cc] ss:$16 sps:$4 sm:$0xff]   ;;  %v5174_v59 = vld [vmem:[#allocation8 + $0x2c0] ss:$16 sps:$4 sm:$0xff]  }
  0x73   :  { %1196 = vmatpush1.bf16.msra.mxu0 %v5082_v26  ;;  %1278 = vmatpush1.bf16.msra.mxu1 %v5083_v27  ;;  %v4997_v8 = vpack.c.bf16 %v324_v4, %v324_v4  ;;  %v4996_v24 = vpack.c.bf16 %v323_v19, %v323_v19  ;;  %v5146_v26 = vld [vmem:[#allocation8 + $0x224] ss:$16 sps:$4 sm:$0xff]   ;;  %v5149_v27 = vld [vmem:[#allocation8 + $0x22c] ss:$16 sps:$4 sm:$0xff]   ;;  %v5180_v7 = vld [vmem:[#allocation8 + $0x2e0] ss:$16 sps:$4 sm:$0xff]  }
  0x74   :  { %1197 = vmatprep.subr.bf16.mxu0 %v5084_v28  ;;  %1279 = vmatprep.subr.bf16.mxu1 %v5086_v29  ;;  %v5144_v28 = vld [vmem:[#allocation8 + $0x220] ss:$16 sps:$4 sm:$0xff]   ;;  %v5147_v29 = vld [vmem:[#allocation8 + $0x228] ss:$16 sps:$4 sm:$0xff]   ;;  %v5185_v4 = vld [vmem:[#allocation8 + $0x2ec] ss:$16 sps:$4 sm:$0xff]  }
  0x75   :  { %1215 = vmatprep.mubr.bf16.mxu0 %v4997_v8  ;;  %1297 = vmatprep.mubr.bf16.mxu1 %v4997_v8  ;;  %v6187_v63 = vld [vmem:[%s6551_s1 + $0x18] sm:$0xff]  ;;  %v5191_v13 = vld [vmem:[#allocation8 + $0x30c] ss:$16 sps:$4 sm:$0xff]   ;;  %v5186_v14 = vld [vmem:[#allocation8 + $0x300] ss:$16 sps:$4 sm:$0xff]  }
  0x76   :  { %v5195_v19 = vld [vmem:[#allocation8 + $0x328] ss:$16 sps:$4 sm:$0xff]  }
  0x77   :  { %1198 = vmatpush1.bf16.msra.mxu0 %v5088_v30  ;;  %1280 = vmatpush1.bf16.msra.mxu1 %v5089_v31  ;;  %v5152_v30 = vld [vmem:[#allocation8 + $0x244] ss:$16 sps:$4 sm:$0xff]   ;;  %v5155_v31 = vld [vmem:[#allocation8 + $0x24c] ss:$16 sps:$4 sm:$0xff]  }
  0x78   :  { %1199 = vmatprep.subr.bf16.mxu0 %v5090_v32  ;;  %1281 = vmatprep.subr.bf16.mxu1 %v5092_v33  ;;  %v5150_v32 = vld [vmem:[#allocation8 + $0x240] ss:$16 sps:$4 sm:$0xff]   ;;  %v5153_v33 = vld [vmem:[#allocation8 + $0x248] ss:$16 sps:$4 sm:$0xff]  }
  0x7b   :  { %1200 = vmatpush1.bf16.msra.mxu0 %v5094_v34  ;;  %1282 = vmatpush1.bf16.msra.mxu1 %v5095_v35  ;;  %v5158_v34 = vld [vmem:[#allocation8 + $0x264] ss:$16 sps:$4 sm:$0xff]   ;;  %v5161_v35 = vld [vmem:[#allocation8 + $0x26c] ss:$16 sps:$4 sm:$0xff]  }
  0x7c   :  { %1201 = vmatprep.subr.bf16.mxu0 %v5096_v36  ;;  %1283 = vmatprep.subr.bf16.mxu1 %v5098_v38  ;;  %v5156_v36 = vld [vmem:[#allocation8 + $0x260] ss:$16 sps:$4 sm:$0xff]   ;;  %v5164_v38 = vld [vmem:[#allocation8 + $0x284] ss:$16 sps:$4 sm:$0xff]  }
  0x7f   :  { %1202 = vmatpush1.bf16.msra.mxu0 %v5100_v39  ;;  %1284 = vmatpush1.bf16.msra.mxu1 %v5101_v40  ;;  %v5167_v39 = vld [vmem:[#allocation8 + $0x28c] ss:$16 sps:$4 sm:$0xff]   ;;  %v5162_v40 = vld [vmem:[#allocation8 + $0x280] ss:$16 sps:$4 sm:$0xff]  }
  0x80   :  { %1203 = vmatprep.subr.bf16.mxu0 %v5102_v41  ;;  %1285 = vmatprep.subr.bf16.mxu1 %v5104_v43  ;;  %v5165_v41 = vld [vmem:[#allocation8 + $0x288] ss:$16 sps:$4 sm:$0xff]   ;;  %v6166_v43 = vsub.s32 3, %v6123_v42 }
  0x83   :  { %1204 = vmatpush1.bf16.msra.mxu0 %v5106_v44  ;;  %1286 = vmatpush1.bf16.msra.mxu1 %v5107_v45  ;;  %v6169_v44 = vsub.s32 2, %v6123_v42  ;;  %v5170_v45 = vld [vmem:[#allocation8 + $0x2a4] ss:$16 sps:$4 sm:$0xff]  }
  0x84   :  { %1205 = vmatprep.subr.bf16.mxu0 %v5108_v46  ;;  %1287 = vmatprep.subr.bf16.mxu1 %v5110_v48  ;;  %v5173_v46 = vld [vmem:[#allocation8 + $0x2ac] ss:$16 sps:$4 sm:$0xff]   ;;  %v5168_v48 = vld [vmem:[#allocation8 + $0x2a0] ss:$16 sps:$4 sm:$0xff]   ;;  %v5176_v42 = vld [vmem:[#allocation8 + $0x2c4] ss:$16 sps:$4 sm:$0xff]  }
  0x85   :  { %v262_v58 = vrot.slane %v6138_v56, %v6169_v44 }
  0x87   :  { %1206 = vmatpush1.bf16.msra.mxu0 %v5112_v49  ;;  %1288 = vmatpush1.bf16.msra.mxu1 %v5113_v50  ;;  %v5171_v49 = vld [vmem:[#allocation8 + $0x2a8] ss:$16 sps:$4 sm:$0xff]   ;;  %v188_v50 = vrot.slane %v6133_v52, %v6166_v43 }
  0x88   :  { %1207 = vmatprep.subr.bf16.mxu0 %v5114_v53  ;;  %1289 = vmatprep.subr.bf16.mxu1 %v5116_v54  ;;  %v266_v53 = vrot.slane %v6138_v56, %v6166_v43  ;;  %v184_v54 = vrot.slane %v6133_v52, %v6169_v44  ;;  %v6192_v52 = vld [vmem:[%s6550_s0 + $0x10] sm:$0xff] }
  0x8b   :  { %1208 = vmatpush1.bf16.msra.mxu0 %v5118_v60  ;;  %1290 = vmatpush1.bf16.msra.mxu1 %v5119_v62  ;;  %v5177_v60 = vld [vmem:[#allocation8 + $0x2c8] ss:$16 sps:$4 sm:$0xff]  }
  0x8c   :  { %1209 = vmatprep.subr.bf16.mxu0 %v5120_v0  ;;  %1291 = vmatprep.subr.bf16.mxu1 %v5122_v1  ;;  %v6182_v62 = vld [vmem:[%s6550_s0 + $0x18] sm:$0xff]  ;;  %v314_v0 = vmul.f32 %v266_v53, %v6187_v63  ;;  %v6199_v1 = vld [vmem:[%s6551_s1 + $0x10] sm:$0xff] }
  0x8d   :  { %v236_v56 = vmul.f32 %v188_v50, %v6182_v62  ;;  %v313_v5 = vmul.f32 %v262_v58, %v6199_v1  ;;  %v5234_v53 = vld [vmem:[#allocation8 + $0x400] ss:$16 sps:$4 sm:$0xff]  }
  0x8e   :  { %v6207_v58 = vld [vmem:[#allocation3 + $0x4] sm:$0xf] }
  0x8f   :  { %1210 = vmatpush1.bf16.msra.mxu0 %v5124_v2  ;;  %1292 = vmatpush1.bf16.msra.mxu1 %v5125_v3  ;;  %v235_v2 = vmul.f32 %v184_v54, %v6192_v52  ;;  %v5182_v3 = vld [vmem:[#allocation8 + $0x2e4] ss:$16 sps:$4 sm:$0xff]   ;;  %v326_v6 = vadd.f32 %v314_v0, %v236_v56  ;;  %v5237_v54 = vld [vmem:[#allocation8 + $0x408] ss:$16 sps:$4 sm:$0xff]   ;;  %v196_v56 = vrot.slane %v6207_v58, %v6126_v47  ;;  %v6212_v0 = vsub.f32 1.0, %v6207_v58 }
  0x90   :  { %1211 = vmatprep.subr.bf16.mxu0 %v5126_v10  ;;  %1293 = vmatprep.subr.bf16.mxu1 %v5128_v11  ;;  %v5183_v10 = vld [vmem:[#allocation8 + $0x2e8] ss:$16 sps:$4 sm:$0xff]  }
  0x91   :  { %v6203_v8 = vadd.f32 %v313_v5, %v235_v2  ;;  %v4999_v11 = vpack.c.bf16 %v326_v6, %v326_v6  ;;  %v5248_v2 = vld [vmem:[#allocation8 + $0x444] ss:$16 sps:$4 sm:$0xff]   ;;  %v238_v5 = vmul.f32 %v196_v56, %v6131_v51  ;;  %v274_v6 = vrot.slane %v6212_v0, %v6126_v47 }
  0x92   :  { %v5314_v56 = vld [vmem:[#allocation8 + $0x5a4] ss:$16 sps:$4 sm:$0xff]  }
  0x93   :  { %1212 = vmatpush1.bf16.msra.mxu0 %v5130_v12  ;;  %1294 = vmatpush1.bf16.msra.mxu1 %v5131_v15  ;;  %v5188_v12 = vld [vmem:[#allocation8 + $0x304] ss:$16 sps:$4 sm:$0xff]   ;;  %v5189_v15 = vld [vmem:[#allocation8 + $0x308] ss:$16 sps:$4 sm:$0xff]   ;;  %v4998_v50 = vpack.c.bf16 %v6203_v8, %v6203_v8  ;;  %v278_v8 = vrot.slane %v6212_v0, %v6169_v44 }
  0x94   :  { %1213 = vmatprep.subr.bf16.mxu0 %v5132_v16  ;;  %1295 = vmatprep.subr.bf16.mxu1 %v5134_v17  ;;  %v5194_v16 = vld [vmem:[#allocation8 + $0x324] ss:$16 sps:$4 sm:$0xff]   ;;  %v5197_v17 = vld [vmem:[#allocation8 + $0x32c] ss:$16 sps:$4 sm:$0xff]  }
  0x95   :  { %v317_v51 = vmul.f32 %v278_v8, %v6199_v1  ;;  %v5266_v1 = vld [vmem:[#allocation8 + $0x4a4] ss:$16 sps:$4 sm:$0xff]   ;;  %v5323_v8 = vld [vmem:[#allocation8 + $0x5cc] ss:$16 sps:$4 sm:$0xff]  }
  0x97   :  { %1214 = vmatpush1.bf16.msra.mxu0 %v5136_v18  ;;  %1296 = vmatpush1.bf16.msra.mxu1 %v5137_v20  ;;  %v5192_v18 = vld [vmem:[#allocation8 + $0x320] ss:$16 sps:$4 sm:$0xff]   ;;  %v5200_v20 = vld [vmem:[#allocation8 + $0x344] ss:$16 sps:$4 sm:$0xff]  }
  0x98   :  { %1224 = vmatprep.subr.bf16.mxu0 %v5140_v21  ;;  %1306 = vmatprep.subr.bf16.mxu1 %v5143_v22  ;;  %v5203_v21 = vld [vmem:[#allocation8 + $0x34c] ss:$16 sps:$4 sm:$0xff]   ;;  %v5198_v22 = vld [vmem:[#allocation8 + $0x340] ss:$16 sps:$4 sm:$0xff]  }
  0x9a   :  { %1216 = vmatmul.mubr.bf16.vlgmr.msra.gmra.mrb[0].mxu0 %v4996_v24  ;;  %1298 = vmatmul.mubr.bf16.vlgmr.msra.gmra.mrb[0].mxu1 %v4996_v24  ;;  %v5206_v24 = vld [vmem:[#allocation8 + $0x364] ss:$16 sps:$4 sm:$0xff]  }
  0x9b   :  { %1225 = vmatpush1.bf16.msra.mxu0 %v5138_v23  ;;  %1307 = vmatpush1.bf16.msra.mxu1 %v5141_v25  ;;  %v5201_v23 = vld [vmem:[#allocation8 + $0x348] ss:$16 sps:$4 sm:$0xff]   ;;  %v5209_v25 = vld [vmem:[#allocation8 + $0x36c] ss:$16 sps:$4 sm:$0xff]  }
  0x9c   :  { %1226 = vmatprep.subr.bf16.mxu0 %v5146_v26  ;;  %1308 = vmatprep.subr.bf16.mxu1 %v5149_v27  ;;  %v5204_v26 = vld [vmem:[#allocation8 + $0x360] ss:$16 sps:$4 sm:$0xff]   ;;  %v5207_v27 = vld [vmem:[#allocation8 + $0x368] ss:$16 sps:$4 sm:$0xff]  }
  0x9d   :  { %1256 = vmatprep.mubr.bf16.mxu0 %v4999_v11  ;;  %1338 = vmatprep.mubr.bf16.mxu1 %v4999_v11  ;;  %v5249_v11 = vld [vmem:[#allocation8 + $0x448] ss:$16 sps:$4 sm:$0xff]  }
  0x9f   :  { %1227 = vmatpush1.bf16.msra.mxu0 %v5144_v28  ;;  %1309 = vmatpush1.bf16.msra.mxu1 %v5147_v29  ;;  %v5212_v28 = vld [vmem:[#allocation8 + $0x384] ss:$16 sps:$4 sm:$0xff]   ;;  %v5215_v29 = vld [vmem:[#allocation8 + $0x38c] ss:$16 sps:$4 sm:$0xff]  }
  0xa0   :  { %1228 = vmatprep.subr.bf16.mxu0 %v5152_v30  ;;  %1310 = vmatprep.subr.bf16.mxu1 %v5155_v31  ;;  %v5210_v30 = vld [vmem:[#allocation8 + $0x380] ss:$16 sps:$4 sm:$0xff]   ;;  %v5213_v31 = vld [vmem:[#allocation8 + $0x388] ss:$16 sps:$4 sm:$0xff]  }
  0xa3   :  { %1229 = vmatpush1.bf16.msra.mxu0 %v5150_v32  ;;  %1311 = vmatpush1.bf16.msra.mxu1 %v5153_v33  ;;  %v5218_v32 = vld [vmem:[#allocation8 + $0x3a4] ss:$16 sps:$4 sm:$0xff]   ;;  %v5221_v33 = vld [vmem:[#allocation8 + $0x3ac] ss:$16 sps:$4 sm:$0xff]  }
  0xa4   :  { %1230 = vmatprep.subr.bf16.mxu0 %v5158_v34  ;;  %1312 = vmatprep.subr.bf16.mxu1 %v5161_v35  ;;  %v5216_v34 = vld [vmem:[#allocation8 + $0x3a0] ss:$16 sps:$4 sm:$0xff]   ;;  %v5219_v35 = vld [vmem:[#allocation8 + $0x3a8] ss:$16 sps:$4 sm:$0xff]  }
  0xa7   :  { %1231 = vmatpush1.bf16.msra.mxu0 %v5156_v36  ;;  %1313 = vmatpush1.bf16.msra.mxu1 %v5159_v37  ;;  %v5224_v36 = vld [vmem:[#allocation8 + $0x3c4] ss:$16 sps:$4 sm:$0xff]   ;;  %v5227_v37 = vld [vmem:[#allocation8 + $0x3cc] ss:$16 sps:$4 sm:$0xff]  }
  0xa8   :  { %1232 = vmatprep.subr.bf16.mxu0 %v5164_v38  ;;  %1314 = vmatprep.subr.bf16.mxu1 %v5167_v39  ;;  %v5222_v38 = vld [vmem:[#allocation8 + $0x3c0] ss:$16 sps:$4 sm:$0xff]   ;;  %v5225_v39 = vld [vmem:[#allocation8 + $0x3c8] ss:$16 sps:$4 sm:$0xff]  }
  0xab   :  { %1233 = vmatpush1.bf16.msra.mxu0 %v5162_v40  ;;  %1315 = vmatpush1.bf16.msra.mxu1 %v5165_v41  ;;  %v5230_v40 = vld [vmem:[#allocation8 + $0x3e4] ss:$16 sps:$4 sm:$0xff]   ;;  %v5233_v41 = vld [vmem:[#allocation8 + $0x3ec] ss:$16 sps:$4 sm:$0xff]  }
  0xac   :  { %1234 = vmatprep.subr.bf16.mxu0 %v5170_v45  ;;  %1316 = vmatprep.subr.bf16.mxu1 %v5173_v46  ;;  %v5228_v45 = vld [vmem:[#allocation8 + $0x3e0] ss:$16 sps:$4 sm:$0xff]   ;;  %v5231_v46 = vld [vmem:[#allocation8 + $0x3e8] ss:$16 sps:$4 sm:$0xff]  }
  0xaf   :  { %1235 = vmatpush1.bf16.msra.mxu0 %v5168_v48  ;;  %1317 = vmatpush1.bf16.msra.mxu1 %v5171_v49  ;;  %v5236_v48 = vld [vmem:[#allocation8 + $0x404] ss:$16 sps:$4 sm:$0xff]   ;;  %v5239_v49 = vld [vmem:[#allocation8 + $0x40c] ss:$16 sps:$4 sm:$0xff]  }
  0xb0   :  { %1236 = vmatprep.subr.bf16.mxu0 %v5176_v42  ;;  %1318 = vmatprep.subr.bf16.mxu1 %v5179_v55  ;;  %v5242_v42 = vld [vmem:[#allocation8 + $0x424] ss:$16 sps:$4 sm:$0xff]   ;;  %v5245_v55 = vld [vmem:[#allocation8 + $0x42c] ss:$16 sps:$4 sm:$0xff]  }
  0xb3   :  { %1237 = vmatpush1.bf16.msra.mxu0 %v5174_v59  ;;  %1319 = vmatpush1.bf16.msra.mxu1 %v5177_v60  ;;  %v5240_v59 = vld [vmem:[#allocation8 + $0x420] ss:$16 sps:$4 sm:$0xff]   ;;  %v5243_v60 = vld [vmem:[#allocation8 + $0x428] ss:$16 sps:$4 sm:$0xff]  }
  0xb4   :  { %1238 = vmatprep.subr.bf16.mxu0 %v5182_v3  ;;  %1320 = vmatprep.subr.bf16.mxu1 %v5185_v4  ;;  %v5251_v3 = vld [vmem:[#allocation8 + $0x44c] ss:$16 sps:$4 sm:$0xff]   ;;  %v200_v4 = vrot.slane %v6207_v58, %v6169_v44 }
  0xb7   :  { %1239 = vmatpush1.bf16.msra.mxu0 %v5180_v7  ;;  %1321 = vmatpush1.bf16.msra.mxu1 %v5183_v10  ;;  %v239_v7 = vmul.f32 %v200_v4, %v6192_v52  ;;  %v5246_v10 = vld [vmem:[#allocation8 + $0x440] ss:$16 sps:$4 sm:$0xff]   ;;  %v270_v4 = vrot.slane %v6212_v0, %v6149_v61 }
  0xb8   :  { %1240 = vmatprep.subr.bf16.mxu0 %v5188_v12  ;;  %1322 = vmatprep.subr.bf16.mxu1 %v5191_v13  ;;  %v316_v12 = vmul.f32 %v274_v6, %v6143_v57  ;;  %v5254_v13 = vld [vmem:[#allocation8 + $0x464] ss:$16 sps:$4 sm:$0xff]   ;;  %v5252_v52 = vld [vmem:[#allocation8 + $0x460] ss:$16 sps:$4 sm:$0xff]   ;;  %v5315_v6 = vld [vmem:[#allocation8 + $0x5a8] ss:$16 sps:$4 sm:$0xff]  }
  0xb9   :  { %v5258_v57 = vld [vmem:[#allocation8 + $0x480] ss:$16 sps:$4 sm:$0xff]  }
  0xbb   :  { %1241 = vmatpush1.bf16.msra.mxu0 %v5186_v14  ;;  %1323 = vmatpush1.bf16.msra.mxu1 %v5189_v15  ;;  %v5257_v14 = vld [vmem:[#allocation8 + $0x46c] ss:$16 sps:$4 sm:$0xff]   ;;  %v328_v15 = vadd.f32 %v316_v12, %v238_v5  ;;  %v5312_v5 = vld [vmem:[#allocation8 + $0x5a0] ss:$16 sps:$4 sm:$0xff]  }
  0xbc   :  { %1242 = vmatprep.subr.bf16.mxu0 %v5194_v16  ;;  %1324 = vmatprep.subr.bf16.mxu1 %v5197_v17  ;;  %v6224_v16 = vadd.f32 %v317_v51, %v239_v7  ;;  %v5255_v17 = vld [vmem:[#allocation8 + $0x468] ss:$16 sps:$4 sm:$0xff]   ;;  %v5320_v7 = vld [vmem:[#allocation8 + $0x5c4] ss:$16 sps:$4 sm:$0xff]   ;;  %v5866_v12 = vld [vmem:[%s6550_s0] sm:$0xff] }
  0xbd   :  { %v5318_v51 = vld [vmem:[#allocation8 + $0x5c0] ss:$16 sps:$4 sm:$0xff]  }
  0xbf   :  { %1243 = vmatpush1.bf16.msra.mxu0 %v5192_v18  ;;  %1325 = vmatpush1.bf16.msra.mxu1 %v5195_v19  ;;  %v5001_v18 = vpack.c.bf16 %v328_v15, %v328_v15  ;;  %v5260_v19 = vld [vmem:[#allocation8 + $0x484] ss:$16 sps:$4 sm:$0xff]   ;;  %v5321_v15 = vld [vmem:[#allocation8 + $0x5c8] ss:$16 sps:$4 sm:$0xff]  }
  0xc0   :  { %1244 = vmatprep.subr.bf16.mxu0 %v5200_v20  ;;  %1326 = vmatprep.subr.bf16.mxu1 %v5203_v21  ;;  %v5263_v20 = vld [vmem:[#allocation8 + $0x48c] ss:$16 sps:$4 sm:$0xff]   ;;  %v5261_v21 = vld [vmem:[#allocation8 + $0x488] ss:$16 sps:$4 sm:$0xff]  }
  0xc3   :  { %1245 = vmatpush1.bf16.msra.mxu0 %v5198_v22  ;;  %1327 = vmatpush1.bf16.msra.mxu1 %v5201_v23  ;;  %v5269_v22 = vld [vmem:[#allocation8 + $0x4ac] ss:$16 sps:$4 sm:$0xff]   ;;  %v5264_v23 = vld [vmem:[#allocation8 + $0x4a0] ss:$16 sps:$4 sm:$0xff]  }
  0xc4   :  { %1246 = vmatprep.subr.bf16.mxu0 %v5206_v24  ;;  %1328 = vmatprep.subr.bf16.mxu1 %v5209_v25  ;;  %v5267_v24 = vld [vmem:[#allocation8 + $0x4a8] ss:$16 sps:$4 sm:$0xff]   ;;  %v5272_v25 = vld [vmem:[#allocation8 + $0x4c4] ss:$16 sps:$4 sm:$0xff]  }
  0xc7   :  { %1247 = vmatpush1.bf16.msra.mxu0 %v5204_v26  ;;  %1329 = vmatpush1.bf16.msra.mxu1 %v5207_v27  ;;  %v5275_v26 = vld [vmem:[#allocation8 + $0x4cc] ss:$16 sps:$4 sm:$0xff]   ;;  %v5270_v27 = vld [vmem:[#allocation8 + $0x4c0] ss:$16 sps:$4 sm:$0xff]  }
  0xc8   :  { %1248 = vmatprep.subr.bf16.mxu0 %v5212_v28  ;;  %1330 = vmatprep.subr.bf16.mxu1 %v5215_v29  ;;  %v5273_v28 = vld [vmem:[#allocation8 + $0x4c8] ss:$16 sps:$4 sm:$0xff]   ;;  %v5278_v29 = vld [vmem:[#allocation8 + $0x4e4] ss:$16 sps:$4 sm:$0xff]  }
  0xcb   :  { %1249 = vmatpush1.bf16.msra.mxu0 %v5210_v30  ;;  %1331 = vmatpush1.bf16.msra.mxu1 %v5213_v31  ;;  %v5281_v30 = vld [vmem:[#allocation8 + $0x4ec] ss:$16 sps:$4 sm:$0xff]   ;;  %v5276_v31 = vld [vmem:[#allocation8 + $0x4e0] ss:$16 sps:$4 sm:$0xff]  }
  0xcc   :  { %1250 = vmatprep.subr.bf16.mxu0 %v5218_v32  ;;  %1332 = vmatprep.subr.bf16.mxu1 %v5221_v33  ;;  %v5279_v32 = vld [vmem:[#allocation8 + $0x4e8] ss:$16 sps:$4 sm:$0xff]   ;;  %v5284_v33 = vld [vmem:[#allocation8 + $0x504] ss:$16 sps:$4 sm:$0xff]  }
  0xcf   :  { %1251 = vmatpush1.bf16.msra.mxu0 %v5216_v34  ;;  %1333 = vmatpush1.bf16.msra.mxu1 %v5219_v35  ;;  %v5287_v34 = vld [vmem:[#allocation8 + $0x50c] ss:$16 sps:$4 sm:$0xff]   ;;  %v5282_v35 = vld [vmem:[#allocation8 + $0x500] ss:$16 sps:$4 sm:$0xff]  }
  0xd0   :  { %1252 = vmatprep.subr.bf16.mxu0 %v5224_v36  ;;  %1334 = vmatprep.subr.bf16.mxu1 %v5227_v37  ;;  %v5285_v36 = vld [vmem:[#allocation8 + $0x508] ss:$16 sps:$4 sm:$0xff]   ;;  %v5290_v37 = vld [vmem:[#allocation8 + $0x524] ss:$16 sps:$4 sm:$0xff]  }
  0xd3   :  { %1253 = vmatpush1.bf16.msra.mxu0 %v5222_v38  ;;  %1335 = vmatpush1.bf16.msra.mxu1 %v5225_v39  ;;  %v5293_v38 = vld [vmem:[#allocation8 + $0x52c] ss:$16 sps:$4 sm:$0xff]   ;;  %v5288_v39 = vld [vmem:[#allocation8 + $0x520] ss:$16 sps:$4 sm:$0xff]  }
  0xd4   :  { %1254 = vmatprep.subr.bf16.mxu0 %v5230_v40  ;;  %1336 = vmatprep.subr.bf16.mxu1 %v5233_v41  ;;  %v5291_v40 = vld [vmem:[#allocation8 + $0x528] ss:$16 sps:$4 sm:$0xff]   ;;  %v5296_v41 = vld [vmem:[#allocation8 + $0x544] ss:$16 sps:$4 sm:$0xff]  }
  0xd7   :  { %1255 = vmatpush1.bf16.msra.mxu0 %v5228_v45  ;;  %1337 = vmatpush1.bf16.msra.mxu1 %v5231_v46  ;;  %v5299_v45 = vld [vmem:[#allocation8 + $0x54c] ss:$16 sps:$4 sm:$0xff]   ;;  %v5294_v46 = vld [vmem:[#allocation8 + $0x540] ss:$16 sps:$4 sm:$0xff]  }
  0xd8   :  { %2130 = vmatprep.subr.bf16.mxu0 %v5236_v48  ;;  %2212 = vmatprep.subr.bf16.mxu1 %v5239_v49  ;;  %v5297_v48 = vld [vmem:[#allocation8 + $0x548] ss:$16 sps:$4 sm:$0xff]   ;;  %v5302_v49 = vld [vmem:[#allocation8 + $0x564] ss:$16 sps:$4 sm:$0xff]  }
  0xda   :  { %1257 = vmatmul.mubr.bf16.vlgmr.msra.gmra.mrb[0].mxu0 %v4998_v50  ;;  %1339 = vmatmul.mubr.bf16.vlgmr.msra.gmra.mrb[0].mxu1 %v4998_v50  ;;  %v5305_v50 = vld [vmem:[#allocation8 + $0x56c] ss:$16 sps:$4 sm:$0xff]  }
  0xdb   :  { %2131 = vmatpush1.bf16.msra.mxu0 %v5234_v53  ;;  %2213 = vmatpush1.bf16.msra.mxu1 %v5237_v54  ;;  %v5300_v53 = vld [vmem:[#allocation8 + $0x560] ss:$16 sps:$4 sm:$0xff]   ;;  %v5303_v54 = vld [vmem:[#allocation8 + $0x568] ss:$16 sps:$4 sm:$0xff]  }
  0xdc   :  { %2132 = vmatprep.subr.bf16.mxu0 %v5242_v42  ;;  %2214 = vmatprep.subr.bf16.mxu1 %v5245_v55  ;;  %v5308_v42 = vld [vmem:[#allocation8 + $0x584] ss:$16 sps:$4 sm:$0xff]   ;;  %v5311_v55 = vld [vmem:[#allocation8 + $0x58c] ss:$16 sps:$4 sm:$0xff]  }
  0xdd   :  { %2162 = vmatprep.mubr.bf16.mxu0 %v5001_v18  ;;  %2244 = vmatprep.mubr.bf16.mxu1 %v5001_v18 }
  0xdf   :  { %2133 = vmatpush1.bf16.msra.mxu0 %v5240_v59  ;;  %2215 = vmatpush1.bf16.msra.mxu1 %v5243_v60  ;;  %v5306_v59 = vld [vmem:[#allocation8 + $0x580] ss:$16 sps:$4 sm:$0xff]   ;;  %v5309_v60 = vld [vmem:[#allocation8 + $0x588] ss:$16 sps:$4 sm:$0xff]  }
  0xe0   :  { %2134 = vmatprep.subr.bf16.mxu0 %v5248_v2  ;;  %2216 = vmatprep.subr.bf16.mxu1 %v5251_v3  ;;  %v5317_v2 = vld [vmem:[#allocation8 + $0x5ac] ss:$16 sps:$4 sm:$0xff]   ;;  %v192_v3 = vrot.slane %v6207_v58, %v6149_v61 }
  0xe3   :  { %2135 = vmatpush1.bf16.msra.mxu0 %v5246_v10  ;;  %2217 = vmatpush1.bf16.msra.mxu1 %v5249_v11  ;;  %v204_v10 = vrot.slane %v6207_v58, %v6166_v43  ;;  %v282_v11 = vrot.slane %v6212_v0, %v6166_v43 }
  0xe4   :  { %2136 = vmatprep.subr.bf16.mxu0 %v5254_v13  ;;  %2218 = vmatprep.subr.bf16.mxu1 %v5257_v14  ;;  %v237_v13 = vmul.f32 %v5866_v12, %v192_v3  ;;  %v315_v14 = vmul.f32 %v270_v4, %v6162_v9  ;;  %v5332_v9 = vld [vmem:[#allocation8 + $0x604] ss:$16 sps:$4 sm:$0xff]   ;;  %v5389_v4 = vld [vmem:[#allocation8 + $0x72c] ss:$16 sps:$4 sm:$0xff]  }
  0xe5   :  { %v240_v58 = vmul.f32 %v204_v10, %v6182_v62  ;;  %v318_v18 = vmul.f32 %v282_v11, %v6187_v63  ;;  %v5338_v62 = vld [vmem:[#allocation8 + $0x624] ss:$16 sps:$4 sm:$0xff]   ;;  %v5390_v10 = vld [vmem:[#allocation8 + $0x740] ss:$16 sps:$4 sm:$0xff]   ;;  %v5393_v11 = vld [vmem:[#allocation8 + $0x748] ss:$16 sps:$4 sm:$0xff]  }
  0xe6   :  { %v327_v0 = vadd.f32 %v315_v14, %v237_v13  ;;  %v5386_v3 = vld [vmem:[#allocation8 + $0x724] ss:$16 sps:$4 sm:$0xff]   ;;  %v5401_v13 = vld [vmem:[#allocation8 + $0x76c] ss:$16 sps:$4 sm:$0xff]   ;;  %v5396_v14 = vld [vmem:[#allocation8 + $0x760] ss:$16 sps:$4 sm:$0xff]  }
  0xe7   :  { %2137 = vmatpush1.bf16.msra.mxu0 %v5252_v52  ;;  %2219 = vmatpush1.bf16.msra.mxu1 %v5255_v17  ;;  %v5326_v52 = vld [vmem:[#allocation8 + $0x5e4] ss:$16 sps:$4 sm:$0xff]   ;;  %v5329_v17 = vld [vmem:[#allocation8 + $0x5ec] ss:$16 sps:$4 sm:$0xff]  }
  0xe8   :  { %2138 = vmatprep.subr.bf16.mxu0 %v5260_v19  ;;  %2220 = vmatprep.subr.bf16.mxu1 %v5263_v20  ;;  %v5324_v19 = vld [vmem:[#allocation8 + $0x5e0] ss:$16 sps:$4 sm:$0xff]   ;;  %v5327_v20 = vld [vmem:[#allocation8 + $0x5e8] ss:$16 sps:$4 sm:$0xff]   ;;  %v5398_v12 = vld [vmem:[#allocation8 + $0x764] ss:$16 sps:$4 sm:$0xff]  }
  0xeb   :  { %2139 = vmatpush1.bf16.msra.mxu0 %v5258_v57  ;;  %2221 = vmatpush1.bf16.msra.mxu1 %v5261_v21  ;;  %v5335_v57 = vld [vmem:[#allocation8 + $0x60c] ss:$16 sps:$4 sm:$0xff]   ;;  %v330_v21 = vadd.f32 %v318_v18, %v240_v58  ;;  %v5405_v58 = vld [vmem:[#allocation8 + $0x788] ss:$16 sps:$4 sm:$0xff]   ;;  %v6240_v18 = vld [vmem:[#allocation3 + $0x8] sm:$0xf] }
  0xec   :  { %2140 = vmatprep.subr.bf16.mxu0 %v5266_v1  ;;  %2222 = vmatprep.subr.bf16.mxu1 %v5269_v22  ;;  %v5000_v1 = vpack.c.bf16 %v327_v0, %v327_v0  ;;  %v5330_v22 = vld [vmem:[#allocation8 + $0x600] ss:$16 sps:$4 sm:$0xff]   ;;  %v5410_v0 = vld [vmem:[#allocation8 + $0x7a4] ss:$16 sps:$4 sm:$0xff]  }
  0xed   :  { %v5003_v63 = vpack.c.bf16 %v330_v21, %v330_v21  ;;  %v5416_v21 = vld [vmem:[#allocation8 + $0x7c4] ss:$16 sps:$4 sm:$0xff]  }
  0xef   :  { %2141 = vmatpush1.bf16.msra.mxu0 %v5264_v23  ;;  %2223 = vmatpush1.bf16.msra.mxu1 %v5267_v24  ;;  %v5333_v23 = vld [vmem:[#allocation8 + $0x608] ss:$16 sps:$4 sm:$0xff]   ;;  %v5341_v24 = vld [vmem:[#allocation8 + $0x62c] ss:$16 sps:$4 sm:$0xff]  }
  0xf0   :  { %2142 = vmatprep.subr.bf16.mxu0 %v5272_v25  ;;  %2224 = vmatprep.subr.bf16.mxu1 %v5275_v26  ;;  %v5336_v25 = vld [vmem:[#allocation8 + $0x620] ss:$16 sps:$4 sm:$0xff]   ;;  %v5339_v26 = vld [vmem:[#allocation8 + $0x628] ss:$16 sps:$4 sm:$0xff]  }
  0xf3   :  { %2143 = vmatpush1.bf16.msra.mxu0 %v5270_v27  ;;  %2225 = vmatpush1.bf16.msra.mxu1 %v5273_v28  ;;  %v5344_v27 = vld [vmem:[#allocation8 + $0x644] ss:$16 sps:$4 sm:$0xff]   ;;  %v5347_v28 = vld [vmem:[#allocation8 + $0x64c] ss:$16 sps:$4 sm:$0xff]  }
  0xf4   :  { %2144 = vmatprep.subr.bf16.mxu0 %v5278_v29  ;;  %2226 = vmatprep.subr.bf16.mxu1 %v5281_v30  ;;  %v5342_v29 = vld [vmem:[#allocation8 + $0x640] ss:$16 sps:$4 sm:$0xff]   ;;  %v5345_v30 = vld [vmem:[#allocation8 + $0x648] ss:$16 sps:$4 sm:$0xff]  }
  0xf7   :  { %2145 = vmatpush1.bf16.msra.mxu0 %v5276_v31  ;;  %2227 = vmatpush1.bf16.msra.mxu1 %v5279_v32  ;;  %v5350_v31 = vld [vmem:[#allocation8 + $0x664] ss:$16 sps:$4 sm:$0xff]   ;;  %v5353_v32 = vld [vmem:[#allocation8 + $0x66c] ss:$16 sps:$4 sm:$0xff]  }
  0xf8   :  { %2146 = vmatprep.subr.bf16.mxu0 %v5284_v33  ;;  %2228 = vmatprep.subr.bf16.mxu1 %v5287_v34  ;;  %v5348_v33 = vld [vmem:[#allocation8 + $0x660] ss:$16 sps:$4 sm:$0xff]   ;;  %v5351_v34 = vld [vmem:[#allocation8 + $0x668] ss:$16 sps:$4 sm:$0xff]  }
  0xfb   :  { %2147 = vmatpush1.bf16.msra.mxu0 %v5282_v35  ;;  %2229 = vmatpush1.bf16.msra.mxu1 %v5285_v36  ;;  %v5356_v35 = vld [vmem:[#allocation8 + $0x684] ss:$16 sps:$4 sm:$0xff]   ;;  %v5359_v36 = vld [vmem:[#allocation8 + $0x68c] ss:$16 sps:$4 sm:$0xff]  }
  0xfc   :  { %2148 = vmatprep.subr.bf16.mxu0 %v5290_v37  ;;  %2230 = vmatprep.subr.bf16.mxu1 %v5293_v38  ;;  %v5354_v37 = vld [vmem:[#allocation8 + $0x680] ss:$16 sps:$4 sm:$0xff]   ;;  %v5357_v38 = vld [vmem:[#allocation8 + $0x688] ss:$16 sps:$4 sm:$0xff]  }
  0xff   :  { %2149 = vmatpush1.bf16.msra.mxu0 %v5288_v39  ;;  %2231 = vmatpush1.bf16.msra.mxu1 %v5291_v40  ;;  %v5362_v39 = vld [vmem:[#allocation8 + $0x6a4] ss:$16 sps:$4 sm:$0xff]   ;;  %v5365_v40 = vld [vmem:[#allocation8 + $0x6ac] ss:$16 sps:$4 sm:$0xff]  }
 0x100   :  { %2150 = vmatprep.subr.bf16.mxu0 %v5296_v41  ;;  %2232 = vmatprep.subr.bf16.mxu1 %v5299_v45  ;;  %v5360_v41 = vld [vmem:[#allocation8 + $0x6a0] ss:$16 sps:$4 sm:$0xff]   ;;  %v5363_v45 = vld [vmem:[#allocation8 + $0x6a8] ss:$16 sps:$4 sm:$0xff]  }
 0x103   :  { %2151 = vmatpush1.bf16.msra.mxu0 %v5294_v46  ;;  %2233 = vmatpush1.bf16.msra.mxu1 %v5297_v48  ;;  %v5368_v46 = vld [vmem:[#allocation8 + $0x6c4] ss:$16 sps:$4 sm:$0xff]   ;;  %v5371_v48 = vld [vmem:[#allocation8 + $0x6cc] ss:$16 sps:$4 sm:$0xff]  }
 0x104   :  { %2152 = vmatprep.subr.bf16.mxu0 %v5302_v49  ;;  %2234 = vmatprep.subr.bf16.mxu1 %v5305_v50  ;;  %v5366_v49 = vld [vmem:[#allocation8 + $0x6c0] ss:$16 sps:$4 sm:$0xff]   ;;  %v5369_v50 = vld [vmem:[#allocation8 + $0x6c8] ss:$16 sps:$4 sm:$0xff]  }
 0x107   :  { %2153 = vmatpush1.bf16.msra.mxu0 %v5300_v53  ;;  %2235 = vmatpush1.bf16.msra.mxu1 %v5303_v54  ;;  %v5374_v53 = vld [vmem:[#allocation8 + $0x6e4] ss:$16 sps:$4 sm:$0xff]   ;;  %v5377_v54 = vld [vmem:[#allocation8 + $0x6ec] ss:$16 sps:$4 sm:$0xff]  }
 0x108   :  { %2154 = vmatprep.subr.bf16.mxu0 %v5308_v42  ;;  %2236 = vmatprep.subr.bf16.mxu1 %v5311_v55  ;;  %v5372_v42 = vld [vmem:[#allocation8 + $0x6e0] ss:$16 sps:$4 sm:$0xff]   ;;  %v5375_v55 = vld [vmem:[#allocation8 + $0x6e8] ss:$16 sps:$4 sm:$0xff]  }
 0x10b   :  { %2155 = vmatpush1.bf16.msra.mxu0 %v5306_v59  ;;  %2237 = vmatpush1.bf16.msra.mxu1 %v5309_v60  ;;  %v5380_v59 = vld [vmem:[#allocation8 + $0x704] ss:$16 sps:$4 sm:$0xff]   ;;  %v5383_v60 = vld [vmem:[#allocation8 + $0x70c] ss:$16 sps:$4 sm:$0xff]  }
 0x10c   :  { %2156 = vmatprep.subr.bf16.mxu0 %v5314_v56  ;;  %2238 = vmatprep.subr.bf16.mxu1 %v5317_v2  ;;  %v5378_v56 = vld [vmem:[#allocation8 + $0x700] ss:$16 sps:$4 sm:$0xff]   ;;  %v5381_v2 = vld [vmem:[#allocation8 + $0x708] ss:$16 sps:$4 sm:$0xff]  }
 0x10f   :  { %2157 = vmatpush1.bf16.msra.mxu0 %v5312_v5  ;;  %2239 = vmatpush1.bf16.msra.mxu1 %v5315_v6  ;;  %v5384_v5 = vld [vmem:[#allocation8 + $0x720] ss:$16 sps:$4 sm:$0xff]   ;;  %v5387_v6 = vld [vmem:[#allocation8 + $0x728] ss:$16 sps:$4 sm:$0xff]  }
 0x110   :  { %2158 = vmatprep.subr.bf16.mxu0 %v5320_v7  ;;  %2240 = vmatprep.subr.bf16.mxu1 %v5323_v8  ;;  %v5392_v7 = vld [vmem:[#allocation8 + $0x744] ss:$16 sps:$4 sm:$0xff]   ;;  %v5395_v8 = vld [vmem:[#allocation8 + $0x74c] ss:$16 sps:$4 sm:$0xff]  }
 0x113   :  { %2159 = vmatpush1.bf16.msra.mxu0 %v5318_v51  ;;  %2241 = vmatpush1.bf16.msra.mxu1 %v5321_v15  ;;  %v5399_v51 = vld [vmem:[#allocation8 + $0x768] ss:$16 sps:$4 sm:$0xff]   ;;  %v5404_v15 = vld [vmem:[#allocation8 + $0x784] ss:$16 sps:$4 sm:$0xff]  }
 0x114   :  { %2160 = vmatprep.subr.bf16.mxu0 %v5326_v52  ;;  %2242 = vmatprep.subr.bf16.mxu1 %v5329_v17  ;;  %v5407_v52 = vld [vmem:[#allocation8 + $0x78c] ss:$16 sps:$4 sm:$0xff]   ;;  %v5402_v17 = vld [vmem:[#allocation8 + $0x780] ss:$16 sps:$4 sm:$0xff]  }
 0x117   :  { %2161 = vmatpush1.bf16.msra.mxu0 %v5324_v19  ;;  %2243 = vmatpush1.bf16.msra.mxu1 %v5327_v20  ;;  %v5413_v19 = vld [vmem:[#allocation8 + $0x7ac] ss:$16 sps:$4 sm:$0xff]   ;;  %v6243_v20 = vsub.f32 1.0, %v6240_v18 }
 0x118   :  { %2171 = vmatprep.subr.bf16.mxu0 %v5332_v9  ;;  %2253 = vmatprep.subr.bf16.mxu1 %v5335_v57  ;;  %v5408_v9 = vld [vmem:[#allocation8 + $0x7a0] ss:$16 sps:$4 sm:$0xff]   ;;  %v5411_v57 = vld [vmem:[#allocation8 + $0x7a8] ss:$16 sps:$4 sm:$0xff]  }
 0x11a   :  { %2163 = vmatmul.mubr.bf16.vlgmr.msra.gmra.mrb[4].mxu0 %v5000_v1  ;;  %2245 = vmatmul.mubr.bf16.vlgmr.msra.gmra.mrb[4].mxu1 %v5000_v1  ;;  %v5419_v1 = vld [vmem:[#allocation8 + $0x7cc] ss:$16 sps:$4 sm:$0xff]  }
 0x11b   :  { %2172 = vmatpush1.bf16.msra.mxu0 %v5330_v22  ;;  %2254 = vmatpush1.bf16.msra.mxu1 %v5333_v23  ;;  %v212_v22 = vrot.slane %v6240_v18, %v6126_v47  ;;  %v290_v23 = vrot.slane %v6243_v20, %v6126_v47 }
 0x11c   :  { %2173 = vmatprep.subr.bf16.mxu0 %v5338_v62  ;;  %2255 = vmatprep.subr.bf16.mxu1 %v5341_v24  ;;  %v5414_v62 = vld [vmem:[#allocation8 + $0x7c0] ss:$16 sps:$4 sm:$0xff]   ;;  %v5417_v24 = vld [vmem:[#allocation8 + $0x7c8] ss:$16 sps:$4 sm:$0xff]  }
 0x11d   :  { %2203 = vmatprep.mubr.bf16.mxu0 %v5003_v63  ;;  %2285 = vmatprep.mubr.bf16.mxu1 %v5003_v63  ;;  %v5422_v63 = vld [vmem:[#allocation8 + $0x7e4] ss:$16 sps:$4 sm:$0xff]  }
 0x11f   :  { %2174 = vmatpush1.bf16.msra.mxu0 %v5336_v25  ;;  %2256 = vmatpush1.bf16.msra.mxu1 %v5339_v26  ;;  %v5425_v25 = vld [vmem:[#allocation8 + $0x7ec] ss:$16 sps:$4 sm:$0xff]   ;;  %v5867_v26 = vld [vmem:[%s6550_s0 + $0x8] sm:$0xff] }
 0x120   :  { %2175 = vmatprep.subr.bf16.mxu0 %v5344_v27  ;;  %2257 = vmatprep.subr.bf16.mxu1 %v5347_v28  ;;  %v242_v27 = vmul.f32 %v5867_v26, %v212_v22  ;;  %v5868_v28 = vld [vmem:[%s6551_s1 + $0x8] sm:$0xff]  ;;  %v5473_v22 = vld [vmem:[#allocation8 + $0x8ec] ss:$16 sps:$4 sm:$0xff]  }
 0x121   :  { %v5477_v26 = vld [vmem:[#allocation8 + $0x908] ss:$16 sps:$4 sm:$0xff]  }
 0x123   :  { %2176 = vmatpush1.bf16.msra.mxu0 %v5342_v29  ;;  %2258 = vmatpush1.bf16.msra.mxu1 %v5345_v30  ;;  %v320_v29 = vmul.f32 %v5868_v28, %v290_v23  ;;  %v5420_v30 = vld [vmem:[#allocation8 + $0x7e0] ss:$16 sps:$4 sm:$0xff]   ;;  %v5485_v28 = vld [vmem:[#allocation8 + $0x92c] ss:$16 sps:$4 sm:$0xff]  }
 0x124   :  { %2177 = vmatprep.subr.bf16.mxu0 %v5350_v31  ;;  %2259 = vmatprep.subr.bf16.mxu1 %v5353_v32  ;;  %v5423_v31 = vld [vmem:[#allocation8 + $0x7e8] ss:$16 sps:$4 sm:$0xff]   ;;  %v5428_v32 = vld [vmem:[#allocation8 + $0x804] ss:$16 sps:$4 sm:$0xff]   ;;  %v5468_v23 = vld [vmem:[#allocation8 + $0x8e0] ss:$16 sps:$4 sm:$0xff]  }
 0x127   :  { %2178 = vmatpush1.bf16.msra.mxu0 %v5348_v33  ;;  %2260 = vmatpush1.bf16.msra.mxu1 %v5351_v34  ;;  %v5431_v33 = vld [vmem:[#allocation8 + $0x80c] ss:$16 sps:$4 sm:$0xff]   ;;  %v332_v34 = vadd.f32 %v320_v29, %v242_v27  ;;  %v5482_v27 = vld [vmem:[#allocation8 + $0x924] ss:$16 sps:$4 sm:$0xff]   ;;  %v5480_v29 = vld [vmem:[#allocation8 + $0x920] ss:$16 sps:$4 sm:$0xff]  }
 0x128   :  { %2179 = vmatprep.subr.bf16.mxu0 %v5356_v35  ;;  %2261 = vmatprep.subr.bf16.mxu1 %v5359_v36  ;;  %v5002_v35 = vpack.c.bf16 %v6224_v16, %v6224_v16  ;;  %v5426_v36 = vld [vmem:[#allocation8 + $0x800] ss:$16 sps:$4 sm:$0xff]   ;;  %v294_v16 = vrot.slane %v6243_v20, %v6169_v44 }
 0x12b   :  { %2180 = vmatpush1.bf16.msra.mxu0 %v5354_v37  ;;  %2262 = vmatpush1.bf16.msra.mxu1 %v5357_v38  ;;  %v5429_v37 = vld [vmem:[#allocation8 + $0x808] ss:$16 sps:$4 sm:$0xff]   ;;  %v5434_v38 = vld [vmem:[#allocation8 + $0x824] ss:$16 sps:$4 sm:$0xff]  }
 0x12c   :  { %2181 = vmatprep.subr.bf16.mxu0 %v5362_v39  ;;  %2263 = vmatprep.subr.bf16.mxu1 %v5365_v40  ;;  %v5437_v39 = vld [vmem:[#allocation8 + $0x82c] ss:$16 sps:$4 sm:$0xff]   ;;  %v220_v40 = vrot.slane %v6240_v18, %v6166_v43 }
 0x12f   :  { %2182 = vmatpush1.bf16.msra.mxu0 %v5360_v41  ;;  %2264 = vmatpush1.bf16.msra.mxu1 %v5363_v45  ;;  %v298_v41 = vrot.slane %v6243_v20, %v6166_v43  ;;  %v216_v45 = vrot.slane %v6240_v18, %v6169_v44 }
 0x130   :  { %2183 = vmatprep.subr.bf16.mxu0 %v5368_v46  ;;  %2265 = vmatprep.subr.bf16.mxu1 %v5371_v48  ;;  %v5005_v46 = vpack.c.bf16 %v332_v34, %v332_v34  ;;  %v5432_v48 = vld [vmem:[#allocation8 + $0x820] ss:$16 sps:$4 sm:$0xff]   ;;  %v5489_v34 = vld [vmem:[#allocation8 + $0x948] ss:$16 sps:$4 sm:$0xff]  }
 0x133   :  { %2184 = vmatpush1.bf16.msra.mxu0 %v5366_v49  ;;  %2266 = vmatpush1.bf16.msra.mxu1 %v5369_v50  ;;  %v5869_v49 = vld [vmem:[%s6550_s0 + $0x18] sm:$0xff] }
 0x134   :  { %2185 = vmatprep.subr.bf16.mxu0 %v5374_v53  ;;  %2267 = vmatprep.subr.bf16.mxu1 %v5377_v54  ;;  %v244_v50 = vmul.f32 %v5869_v49, %v220_v40  ;;  %v5870_v53 = vld [vmem:[%s6551_s1 + $0x18] sm:$0xff]  ;;  %v5503_v40 = vld [vmem:[#allocation8 + $0x98c] ss:$16 sps:$4 sm:$0xff]   ;;  %v286_v49 = vrot.slane %v6243_v20, %v6149_v61  ;;  %v5510_v20 = vld [vmem:[#allocation8 + $0x9c0] ss:$16 sps:$4 sm:$0xff]  }
 0x135   :  { %v322_v54 = vmul.f32 %v5870_v53, %v298_v41  ;;  %v5498_v41 = vld [vmem:[#allocation8 + $0x980] ss:$16 sps:$4 sm:$0xff]   ;;  %v5507_v53 = vld [vmem:[#allocation8 + $0x9a8] ss:$16 sps:$4 sm:$0xff]  }
 0x137   :  { %2186 = vmatpush1.bf16.msra.mxu0 %v5372_v42  ;;  %2268 = vmatpush1.bf16.msra.mxu1 %v5375_v55  ;;  %v5871_v42 = vld [vmem:[%s6550_s0 + $0x10] sm:$0xff] }
 0x138   :  { %2187 = vmatprep.subr.bf16.mxu0 %v5380_v59  ;;  %2269 = vmatprep.subr.bf16.mxu1 %v5383_v60  ;;  %v243_v55 = vmul.f32 %v5871_v42, %v216_v45  ;;  %v5435_v59 = vld [vmem:[#allocation8 + $0x828] ss:$16 sps:$4 sm:$0xff]   ;;  %v5872_v60 = vld [vmem:[%s6551_s1 + $0x10] sm:$0xff] }
 0x139   :  { %v5501_v45 = vld [vmem:[#allocation8 + $0x988] ss:$16 sps:$4 sm:$0xff]   ;;  %v5515_v42 = vld [vmem:[#allocation8 + $0x9cc] ss:$16 sps:$4 sm:$0xff]  }
 0x13b   :  { %2188 = vmatpush1.bf16.msra.mxu0 %v5378_v56  ;;  %2270 = vmatpush1.bf16.msra.mxu1 %v5381_v2  ;;  %v321_v56 = vmul.f32 %v5872_v60, %v294_v16  ;;  %v5440_v2 = vld [vmem:[#allocation8 + $0x844] ss:$16 sps:$4 sm:$0xff]   ;;  %v5509_v16 = vld [vmem:[#allocation8 + $0x9ac] ss:$16 sps:$4 sm:$0xff]  }
 0x13c   :  { %2189 = vmatprep.subr.bf16.mxu0 %v5386_v3  ;;  %2271 = vmatprep.subr.bf16.mxu1 %v5389_v4  ;;  %v5443_v3 = vld [vmem:[#allocation8 + $0x84c] ss:$16 sps:$4 sm:$0xff]   ;;  %v6277_v4 = vadd.f32 %v322_v54, %v244_v50  ;;  %v5504_v50 = vld [vmem:[#allocation8 + $0x9a0] ss:$16 sps:$4 sm:$0xff]   ;;  %v5512_v54 = vld [vmem:[#allocation8 + $0x9c4] ss:$16 sps:$4 sm:$0xff]  }
 0x13f   :  { %2190 = vmatpush1.bf16.msra.mxu0 %v5384_v5  ;;  %2272 = vmatpush1.bf16.msra.mxu1 %v5387_v6  ;;  %v6279_v5 = vadd.f32 %v321_v56, %v243_v55  ;;  %v5438_v6 = vld [vmem:[#allocation8 + $0x840] ss:$16 sps:$4 sm:$0xff]   ;;  %v5513_v56 = vld [vmem:[#allocation8 + $0x9c8] ss:$16 sps:$4 sm:$0xff]  }
 0x140   :  { %2191 = vmatprep.subr.bf16.mxu0 %v5392_v7  ;;  %2273 = vmatprep.subr.bf16.mxu1 %v5395_v8  ;;  %v5441_v7 = vld [vmem:[#allocation8 + $0x848] ss:$16 sps:$4 sm:$0xff]   ;;  %v5446_v8 = vld [vmem:[#allocation8 + $0x864] ss:$16 sps:$4 sm:$0xff]   ;;  %v5873_v55 = vld [vmem:[%s6550_s0] sm:$0xff] }
 0x143   :  { %2192 = vmatpush1.bf16.msra.mxu0 %v5390_v10  ;;  %2274 = vmatpush1.bf16.msra.mxu1 %v5393_v11  ;;  %v5449_v10 = vld [vmem:[#allocation8 + $0x86c] ss:$16 sps:$4 sm:$0xff]   ;;  %v5444_v11 = vld [vmem:[#allocation8 + $0x860] ss:$16 sps:$4 sm:$0xff]  }
 0x144   :  { %2193 = vmatprep.subr.bf16.mxu0 %v5398_v12  ;;  %2275 = vmatprep.subr.bf16.mxu1 %v5401_v13  ;;  %v5447_v12 = vld [vmem:[#allocation8 + $0x868] ss:$16 sps:$4 sm:$0xff]   ;;  %v5452_v13 = vld [vmem:[#allocation8 + $0x884] ss:$16 sps:$4 sm:$0xff]  }
 0x147   :  { %2194 = vmatpush1.bf16.msra.mxu0 %v5396_v14  ;;  %2276 = vmatpush1.bf16.msra.mxu1 %v5399_v51  ;;  %v5455_v14 = vld [vmem:[#allocation8 + $0x88c] ss:$16 sps:$4 sm:$0xff]   ;;  %v5450_v51 = vld [vmem:[#allocation8 + $0x880] ss:$16 sps:$4 sm:$0xff]  }
 0x148   :  { %2195 = vmatprep.subr.bf16.mxu0 %v5404_v15  ;;  %2277 = vmatprep.subr.bf16.mxu1 %v5407_v52  ;;  %v5453_v15 = vld [vmem:[#allocation8 + $0x888] ss:$16 sps:$4 sm:$0xff]   ;;  %v5458_v52 = vld [vmem:[#allocation8 + $0x8a4] ss:$16 sps:$4 sm:$0xff]  }
 0x14b   :  { %2196 = vmatpush1.bf16.msra.mxu0 %v5402_v17  ;;  %2278 = vmatpush1.bf16.msra.mxu1 %v5405_v58  ;;  %v5461_v17 = vld [vmem:[#allocation8 + $0x8ac] ss:$16 sps:$4 sm:$0xff]   ;;  %v5456_v58 = vld [vmem:[#allocation8 + $0x8a0] ss:$16 sps:$4 sm:$0xff]  }
 0x14c   :  { %2197 = vmatprep.subr.bf16.mxu0 %v5410_v0  ;;  %2279 = vmatprep.subr.bf16.mxu1 %v5413_v19  ;;  %v5459_v0 = vld [vmem:[#allocation8 + $0x8a8] ss:$16 sps:$4 sm:$0xff]   ;;  %v5464_v19 = vld [vmem:[#allocation8 + $0x8c4] ss:$16 sps:$4 sm:$0xff]  }
 0x14f   :  { %2198 = vmatpush1.bf16.msra.mxu0 %v5408_v9  ;;  %2280 = vmatpush1.bf16.msra.mxu1 %v5411_v57  ;;  %v5467_v9 = vld [vmem:[#allocation8 + $0x8cc] ss:$16 sps:$4 sm:$0xff]   ;;  %v5462_v57 = vld [vmem:[#allocation8 + $0x8c0] ss:$16 sps:$4 sm:$0xff]  }
 0x150   :  { %2199 = vmatprep.subr.bf16.mxu0 %v5416_v21  ;;  %2281 = vmatprep.subr.bf16.mxu1 %v5419_v1  ;;  %v5465_v21 = vld [vmem:[#allocation8 + $0x8c8] ss:$16 sps:$4 sm:$0xff]   ;;  %v5470_v1 = vld [vmem:[#allocation8 + $0x8e4] ss:$16 sps:$4 sm:$0xff]  }
 0x153   :  { %2200 = vmatpush1.bf16.msra.mxu0 %v5414_v62  ;;  %2282 = vmatpush1.bf16.msra.mxu1 %v5417_v24  ;;  %v5471_v62 = vld [vmem:[#allocation8 + $0x8e8] ss:$16 sps:$4 sm:$0xff]   ;;  %v5476_v24 = vld [vmem:[#allocation8 + $0x904] ss:$16 sps:$4 sm:$0xff]  }
 0x154   :  { %2201 = vmatprep.subr.bf16.mxu0 %v5422_v63  ;;  %2283 = vmatprep.subr.bf16.mxu1 %v5425_v25  ;;  %v5479_v63 = vld [vmem:[#allocation8 + $0x90c] ss:$16 sps:$4 sm:$0xff]   ;;  %v5474_v25 = vld [vmem:[#allocation8 + $0x900] ss:$16 sps:$4 sm:$0xff]  }
 0x157   :  { %2202 = vmatpush1.bf16.msra.mxu0 %v5420_v30  ;;  %2284 = vmatpush1.bf16.msra.mxu1 %v5423_v31  ;;  %v5483_v30 = vld [vmem:[#allocation8 + $0x928] ss:$16 sps:$4 sm:$0xff]   ;;  %v5488_v31 = vld [vmem:[#allocation8 + $0x944] ss:$16 sps:$4 sm:$0xff]  }
 0x158   :  { %3077 = vmatprep.subr.bf16.mxu0 %v5428_v32  ;;  %3159 = vmatprep.subr.bf16.mxu1 %v5431_v33  ;;  %v5491_v32 = vld [vmem:[#allocation8 + $0x94c] ss:$16 sps:$4 sm:$0xff]   ;;  %v5486_v33 = vld [vmem:[#allocation8 + $0x940] ss:$16 sps:$4 sm:$0xff]  }
 0x15a   :  { %2204 = vmatmul.mubr.bf16.vlgmr.msra.gmra.mrb[4].mxu0 %v5002_v35  ;;  %2286 = vmatmul.mubr.bf16.vlgmr.msra.gmra.mrb[4].mxu1 %v5002_v35  ;;  %v5494_v35 = vld [vmem:[#allocation8 + $0x964] ss:$16 sps:$4 sm:$0xff]  }
 0x15b   :  { %3078 = vmatpush1.bf16.msra.mxu0 %v5426_v36  ;;  %3160 = vmatpush1.bf16.msra.mxu1 %v5429_v37  ;;  %v5497_v36 = vld [vmem:[#allocation8 + $0x96c] ss:$16 sps:$4 sm:$0xff]   ;;  %v5492_v37 = vld [vmem:[#allocation8 + $0x960] ss:$16 sps:$4 sm:$0xff]  }
 0x15c   :  { %3079 = vmatprep.subr.bf16.mxu0 %v5434_v38  ;;  %3161 = vmatprep.subr.bf16.mxu1 %v5437_v39  ;;  %v5495_v38 = vld [vmem:[#allocation8 + $0x968] ss:$16 sps:$4 sm:$0xff]   ;;  %v5500_v39 = vld [vmem:[#allocation8 + $0x984] ss:$16 sps:$4 sm:$0xff]  }
 0x15d   :  { %3109 = vmatprep.mubr.bf16.mxu0 %v5005_v46  ;;  %3191 = vmatprep.mubr.bf16.mxu1 %v5005_v46  ;;  %v5506_v46 = vld [vmem:[#allocation8 + $0x9a4] ss:$16 sps:$4 sm:$0xff]  }
 0x15f   :  { %3080 = vmatpush1.bf16.msra.mxu0 %v5432_v48  ;;  %3162 = vmatpush1.bf16.msra.mxu1 %v5435_v59  ;;  %v208_v48 = vrot.slane %v6240_v18, %v6149_v61  ;;  %v5874_v18 = vld [vmem:[%s6551_s1] sm:$0xff] }
 0x160   :  { %3081 = vmatprep.subr.bf16.mxu0 %v5440_v2  ;;  %3163 = vmatprep.subr.bf16.mxu1 %v5443_v3  ;;  %v319_v60 = vmul.f32 %v5874_v18, %v286_v49  ;;  %v5518_v2 = vld [vmem:[#allocation8 + $0x9e4] ss:$16 sps:$4 sm:$0xff]   ;;  %v5521_v3 = vld [vmem:[#allocation8 + $0x9ec] ss:$16 sps:$4 sm:$0xff]  }
 0x161   :  { %v241_v59 = vmul.f32 %v5873_v55, %v208_v48  ;;  %v5560_v49 = vld [vmem:[#allocation8 + $0xac4] ss:$16 sps:$4 sm:$0xff]  }
 0x163   :  { %3082 = vmatpush1.bf16.msra.mxu0 %v5438_v6  ;;  %3164 = vmatpush1.bf16.msra.mxu1 %v5441_v7  ;;  %v331_v6 = vadd.f32 %v319_v60, %v241_v59  ;;  %v5516_v7 = vld [vmem:[#allocation8 + $0x9e0] ss:$16 sps:$4 sm:$0xff]   ;;  %v5563_v59 = vld [vmem:[#allocation8 + $0xacc] ss:$16 sps:$4 sm:$0xff]  }
 0x164   :  { %3083 = vmatprep.subr.bf16.mxu0 %v5446_v8  ;;  %3165 = vmatprep.subr.bf16.mxu1 %v5449_v10  ;;  %v5519_v8 = vld [vmem:[#allocation8 + $0x9e8] ss:$16 sps:$4 sm:$0xff]   ;;  %v5524_v10 = vld [vmem:[#allocation8 + $0xa04] ss:$16 sps:$4 sm:$0xff]  }
 0x167   :  { %3084 = vmatpush1.bf16.msra.mxu0 %v5444_v11  ;;  %3166 = vmatpush1.bf16.msra.mxu1 %v5447_v12  ;;  %v5527_v11 = vld [vmem:[#allocation8 + $0xa0c] ss:$16 sps:$4 sm:$0xff]   ;;  %v5004_v12 = vpack.c.bf16 %v331_v6, %v331_v6  ;;  %v5558_v6 = vld [vmem:[#allocation8 + $0xac0] ss:$16 sps:$4 sm:$0xff]  }
 0x168   :  { %3085 = vmatprep.subr.bf16.mxu0 %v5452_v13  ;;  %3167 = vmatprep.subr.bf16.mxu1 %v5455_v14  ;;  %v5522_v13 = vld [vmem:[#allocation8 + $0xa00] ss:$16 sps:$4 sm:$0xff]   ;;  %v5525_v14 = vld [vmem:[#allocation8 + $0xa08] ss:$16 sps:$4 sm:$0xff]  }
 0x16b   :  { %3086 = vmatpush1.bf16.msra.mxu0 %v5450_v51  ;;  %3168 = vmatpush1.bf16.msra.mxu1 %v5453_v15  ;;  %v5530_v51 = vld [vmem:[#allocation8 + $0xa24] ss:$16 sps:$4 sm:$0xff]   ;;  %v5533_v15 = vld [vmem:[#allocation8 + $0xa2c] ss:$16 sps:$4 sm:$0xff]  }
 0x16c   :  { %3087 = vmatprep.subr.bf16.mxu0 %v5458_v52  ;;  %3169 = vmatprep.subr.bf16.mxu1 %v5461_v17  ;;  %v5007_v52 = vpack.c.bf16 %v6277_v4, %v6277_v4  ;;  %v5528_v17 = vld [vmem:[#allocation8 + $0xa20] ss:$16 sps:$4 sm:$0xff]   ;;  %v5545_v4 = vld [vmem:[#allocation8 + $0xa6c] ss:$16 sps:$4 sm:$0xff]  }
 0x16f   :  { %3088 = vmatpush1.bf16.msra.mxu0 %v5456_v58  ;;  %3170 = vmatpush1.bf16.msra.mxu1 %v5459_v0  ;;  %v5531_v58 = vld [vmem:[#allocation8 + $0xa28] ss:$16 sps:$4 sm:$0xff]   ;;  %v5536_v0 = vld [vmem:[#allocation8 + $0xa44] ss:$16 sps:$4 sm:$0xff]  }
 0x170   :  { %3089 = vmatprep.subr.bf16.mxu0 %v5464_v19  ;;  %3171 = vmatprep.subr.bf16.mxu1 %v5467_v9  ;;  %v5539_v19 = vld [vmem:[#allocation8 + $0xa4c] ss:$16 sps:$4 sm:$0xff]   ;;  %v5534_v9 = vld [vmem:[#allocation8 + $0xa40] ss:$16 sps:$4 sm:$0xff]  }
 0x173   :  { %3090 = vmatpush1.bf16.msra.mxu0 %v5462_v57  ;;  %3172 = vmatpush1.bf16.msra.mxu1 %v5465_v21  ;;  %v5537_v57 = vld [vmem:[#allocation8 + $0xa48] ss:$16 sps:$4 sm:$0xff]   ;;  %v5542_v21 = vld [vmem:[#allocation8 + $0xa64] ss:$16 sps:$4 sm:$0xff]  }
 0x174   :  { %3091 = vmatprep.subr.bf16.mxu0 %v5470_v1  ;;  %3173 = vmatprep.subr.bf16.mxu1 %v5473_v22  ;;  %v5540_v1 = vld [vmem:[#allocation8 + $0xa60] ss:$16 sps:$4 sm:$0xff]   ;;  %v5543_v22 = vld [vmem:[#allocation8 + $0xa68] ss:$16 sps:$4 sm:$0xff]  }
 0x177   :  { %3092 = vmatpush1.bf16.msra.mxu0 %v5468_v23  ;;  %3174 = vmatpush1.bf16.msra.mxu1 %v5471_v62  ;;  %v3280_v23 = vld [vmem:[#allocation7] sm:$0xf]  ;;  %v5548_v62 = vld [vmem:[#allocation8 + $0xa84] ss:$16 sps:$4 sm:$0xff]  }
 0x178   :  { %3093 = vmatprep.subr.bf16.mxu0 %v5476_v24  ;;  %3175 = vmatprep.subr.bf16.mxu1 %v5479_v63  ;;  %v5551_v24 = vld [vmem:[#allocation8 + $0xa8c] ss:$16 sps:$4 sm:$0xff]   ;;  %v5546_v63 = vld [vmem:[#allocation8 + $0xa80] ss:$16 sps:$4 sm:$0xff]  }
 0x17b   :  { %3094 = vmatpush1.bf16.msra.mxu0 %v5474_v25  ;;  %3176 = vmatpush1.bf16.msra.mxu1 %v5477_v26  ;;  %v5549_v25 = vld [vmem:[#allocation8 + $0xa88] ss:$16 sps:$4 sm:$0xff]   ;;  %v6296_v26 = vld [vmem:[%s6552_s2 + $0x40] sm:$0xff] }
 0x17c   :  { %3095 = vmatprep.subr.bf16.mxu0 %v5482_v27  ;;  %3177 = vmatprep.subr.bf16.mxu1 %v5485_v28  ;;  %v3358_v27 = vrot.slane %v3280_v23, %v6149_v61  ;;  %v3366_v28 = vrot.slane %v3280_v23, %v6169_v44 }
 0x17f   :  { %3096 = vmatpush1.bf16.msra.mxu0 %v5480_v29  ;;  %3178 = vmatpush1.bf16.msra.mxu1 %v5483_v30  ;;  %v6300_v29 = vld [vmem:[#allocation5] sm:$0xf]  ;;  %v6305_v30 = vld [vmem:[%s6552_s2 + $0x50] sm:$0xff] }
 0x180   :  { %3097 = vmatprep.subr.bf16.mxu0 %v5488_v31  ;;  %3179 = vmatprep.subr.bf16.mxu1 %v5491_v32  ;;  %v6310_v31 = vld [vmem:[%s6552_s2 + $0x48] sm:$0xff]  ;;  %v3362_v32 = vrot.slane %v3280_v23, %v6126_v47 }
 0x183   :  { %3098 = vmatpush1.bf16.msra.mxu0 %v5486_v33  ;;  %3180 = vmatpush1.bf16.msra.mxu1 %v5489_v34  ;;  %v3370_v33 = vrot.slane %v3280_v23, %v6166_v43  ;;  %v6317_v34 = vld [vmem:[%s6552_s2 + $0x58] sm:$0xff] }
 0x184   :  { %3099 = vmatprep.subr.bf16.mxu0 %v5494_v35  ;;  %3181 = vmatprep.subr.bf16.mxu1 %v5497_v36  ;;  %v5554_v35 = vld [vmem:[#allocation8 + $0xaa4] ss:$16 sps:$4 sm:$0xff]   ;;  %v5557_v36 = vld [vmem:[#allocation8 + $0xaac] ss:$16 sps:$4 sm:$0xff]  }
 0x187   :  { %3100 = vmatpush1.bf16.msra.mxu0 %v5492_v37  ;;  %3182 = vmatpush1.bf16.msra.mxu1 %v5495_v38  ;;  %v3285_v37 = vrot.slane %v6300_v29, %v6149_v61  ;;  %v3375_v38 = vadd.f32 %v6296_v26, %v3358_v27  ;;  %v5552_v61 = vld [vmem:[#allocation8 + $0xaa0] ss:$16 sps:$4 sm:$0xff]  }
 0x188   :  { %3101 = vmatprep.subr.bf16.mxu0 %v5500_v39  ;;  %3183 = vmatprep.subr.bf16.mxu1 %v5503_v40  ;;  %v3293_v39 = vrot.slane %v6300_v29, %v6169_v44  ;;  %v6325_v40 = vadd.f32 %v6305_v30, %v3366_v28  ;;  %v5575_v28 = vld [vmem:[#allocation8 + $0xb0c] ss:$16 sps:$4 sm:$0xff]  }
 0x18b   :  { %3102 = vmatpush1.bf16.msra.mxu0 %v5498_v41  ;;  %3184 = vmatpush1.bf16.msra.mxu1 %v5501_v45  ;;  %v3289_v41 = vrot.slane %v6300_v29, %v6126_v47  ;;  %v6330_v45 = vadd.f32 %v6310_v31, %v3362_v32 }
 0x18c   :  { %3103 = vmatprep.subr.bf16.mxu0 %v5506_v46  ;;  %3185 = vmatprep.subr.bf16.mxu1 %v5509_v16  ;;  %v6333_v46 = vadd.f32 %v6317_v34, %v3370_v33  ;;  %v5555_v16 = vld [vmem:[#allocation8 + $0xaa8] ss:$16 sps:$4 sm:$0xff]  }
 0x18f   :  { %3104 = vmatpush1.bf16.msra.mxu0 %v5504_v50  ;;  %3186 = vmatpush1.bf16.msra.mxu1 %v5507_v53 }
 0x190   :  { %3105 = vmatprep.subr.bf16.mxu0 %v5512_v54  ;;  %3187 = vmatprep.subr.bf16.mxu1 %v5515_v42 }
 0x193   :  { %3106 = vmatpush1.bf16.msra.mxu0 %v5510_v20  ;;  %3188 = vmatpush1.bf16.msra.mxu1 %v5513_v56  ;;  %v3297_v20 = vrot.slane %v6300_v29, %v6166_v43 }
 0x194   :  { %3107 = vmatprep.subr.bf16.mxu0 %v5518_v2  ;;  %3189 = vmatprep.subr.bf16.mxu1 %v5521_v3 }
 0x197   :  { %3108 = vmatpush1.bf16.msra.mxu0 %v5516_v7  ;;  %3190 = vmatpush1.bf16.msra.mxu1 %v5519_v8 }
 0x198   :  { %3118 = vmatprep.subr.bf16.mxu0 %v5524_v10  ;;  %3200 = vmatprep.subr.bf16.mxu1 %v5527_v11 }
 0x19a   :  { %3110 = vmatmul.mubr.bf16.vlgmr.msra.gmra.mrb[8].mxu0 %v5004_v12  ;;  %3192 = vmatmul.mubr.bf16.vlgmr.msra.gmra.mrb[8].mxu1 %v5004_v12 }
 0x19b   :  { %3119 = vmatpush1.bf16.msra.mxu0 %v5522_v13  ;;  %3201 = vmatpush1.bf16.msra.mxu1 %v5525_v14  ;;  %v5561_v13 = vld [vmem:[#allocation8 + $0xac8] ss:$16 sps:$4 sm:$0xff]   ;;  %v5566_v14 = vld [vmem:[#allocation8 + $0xae4] ss:$16 sps:$4 sm:$0xff]  }
 0x19c   :  { %3120 = vmatprep.subr.bf16.mxu0 %v5530_v51  ;;  %3202 = vmatprep.subr.bf16.mxu1 %v5533_v15 }
 0x19d   :  { %3150 = vmatprep.mubr.bf16.mxu0 %v5007_v52  ;;  %3232 = vmatprep.mubr.bf16.mxu1 %v5007_v52  ;;  %v5569_v52 = vld [vmem:[#allocation8 + $0xaec] ss:$16 sps:$4 sm:$0xff]  }
 0x19f   :  { %3121 = vmatpush1.bf16.msra.mxu0 %v5528_v17  ;;  %3203 = vmatpush1.bf16.msra.mxu1 %v5531_v58 }
 0x1a0   :  { %3122 = vmatprep.subr.bf16.mxu0 %v5536_v0  ;;  %3204 = vmatprep.subr.bf16.mxu1 %v5539_v19 }
 0x1a3   :  { %3123 = vmatpush1.bf16.msra.mxu0 %v5534_v9  ;;  %3205 = vmatpush1.bf16.msra.mxu1 %v5537_v57 }
 0x1a4   :  { %3124 = vmatprep.subr.bf16.mxu0 %v5542_v21  ;;  %3206 = vmatprep.subr.bf16.mxu1 %v5545_v4 }
 0x1a7   :  { %3125 = vmatpush1.bf16.msra.mxu0 %v5540_v1  ;;  %3207 = vmatpush1.bf16.msra.mxu1 %v5543_v22  ;;  %v5564_v1 = vld [vmem:[#allocation8 + $0xae0] ss:$16 sps:$4 sm:$0xff]   ;;  %v5567_v22 = vld [vmem:[#allocation8 + $0xae8] ss:$16 sps:$4 sm:$0xff]  }
 0x1a8   :  { %3126 = vmatprep.subr.bf16.mxu0 %v5548_v62  ;;  %3208 = vmatprep.subr.bf16.mxu1 %v5551_v24 }
 0x1ab   :  { %3127 = vmatpush1.bf16.msra.mxu0 %v5546_v63  ;;  %3209 = vmatpush1.bf16.msra.mxu1 %v5549_v25  ;;  %v5572_v63 = vld [vmem:[#allocation8 + $0xb04] ss:$16 sps:$4 sm:$0xff]  }
 0x1ac   :  { %3128 = vmatprep.subr.bf16.mxu0 %v5554_v35  ;;  %3210 = vmatprep.subr.bf16.mxu1 %v5557_v36  ;;  %v5570_v35 = vld [vmem:[#allocation8 + $0xb00] ss:$16 sps:$4 sm:$0xff]  }
 0x1ad   :  { %v1258_v48 = vpop.f32.mrb[0].mxu0  ;;  %v6335_v44 = vpop.f32.mrb[0].mxu1 }
 0x1ae   :  { %v3302_v50 = vadd.f32 %v3285_v37, %v1258_v48  ;;  %v3379_v53 = vmax.f32 %v3375_v38, %v1258_v48  ;;  %v3304_v54 = vadd.f32 %v3293_v39, %v6335_v44  ;;  %v3381_v47 = vmax.f32 %v6325_v40, %v6335_v44  ;;  %v6340_v42 = vpop.f32.mrb[1].mxu0  ;;  %v6342_v55 = vpop.f32.mrb[1].mxu1  ;;  %v5573_v37 = vld [vmem:[#allocation8 + $0xb08] ss:$16 sps:$4 sm:$0xff]  }
 0x1af   :  { %v6345_v18 = vadd.f32 %v3289_v41, %v6340_v42  ;;  %v6349_v60 = vmax.f32 %v6330_v45, %v6340_v42  ;;  %v6355_v56 = vmax.f32 %v6333_v46, %v6342_v55  ;;  %v1262_v2 = vpop.f32.mrb[2].mxu0  ;;  %v1344_v3 = vpop.f32.mrb[2].mxu1  ;;  %3129 = vmatpush1.bf16.msra.mxu0 %v5552_v61  ;;  %3211 = vmatpush1.bf16.msra.mxu1 %v5555_v16 }
 0x1b0   :  { %v3306_v7 = vmax.f32 %v6296_v26, %v3302_v50  ;;  %v3383_v8 = vsub.f32 %v3375_v38, %v3379_v53  ;;  %v3395_v10 = vsub.f32 %v1258_v48, %v3379_v53  ;;  %4858 = vst [vmem:[%s6559_s9 + $0x40] sm:$0xff] %v3379_v53  ;;  %v3308_v11 = vmax.f32 %v6305_v30, %v3304_v54  ;;  %v1263_v43 = vpop.f32.mrb[3].mxu0  ;;  %v1345_v12 = vpop.f32.mrb[3].mxu1  ;;  %v5578_v38 = vld [vmem:[#allocation8 + $0xb24] ss:$16 sps:$4 sm:$0xff]  }
 0x1b1   :  { %4860 = vst [vmem:[%s6559_s9 + $0x50] sm:$0xff] %v3381_v47  ;;  %v3385_v51 = vsub.f32 %v6325_v40, %v3381_v47  ;;  %v3307_v15 = vmax.f32 %v6310_v31, %v6345_v18  ;;  %4859 = vst [vmem:[%s6559_s9 + $0x48] sm:$0xff] %v6349_v60  ;;  %3130 = vmatprep.subr.bf16.mxu0 %v5560_v49  ;;  %3212 = vmatprep.subr.bf16.mxu1 %v5563_v59  ;;  %v5576_v49 = vld [vmem:[#allocation8 + $0xb20] ss:$16 sps:$4 sm:$0xff]   ;;  %v5579_v53 = vld [vmem:[#allocation8 + $0xb28] ss:$16 sps:$4 sm:$0xff]  }
 0x1b2   :  { %4861 = vst [vmem:[%s6559_s9 + $0x58] sm:$0xff] %v6355_v56  ;;  %v3310_v17 = vsub.f32 %v6296_v26, %v3306_v7  ;;  %v3322_v58 = vsub.f32 %v3302_v50, %v3306_v7  ;;  %v3387_v0 = vmul.f32 1.442695, %v3383_v8  ;;  %v3399_v19 = vmul.f32 1.442695, %v3395_v10 }
 0x1b3   :  { %v3312_v9 = vsub.f32 %v6305_v30, %v3308_v11  ;;  %v3324_v57 = vsub.f32 %v3304_v54, %v3308_v11  ;;  %v3397_v21 = vsub.f32 %v6335_v44, %v3381_v47  ;;  %v3305_v4 = vadd.f32 %v3297_v20, %v6342_v55  ;;  %3131 = vmatpush1.bf16.msra.mxu0 %v5558_v6  ;;  %v5584_v54 = vld [vmem:[#allocation8 + $0xb44] ss:$16 sps:$4 sm:$0xff]   ;;  %v5582_v20 = vld [vmem:[#allocation8 + $0xb40] ss:$16 sps:$4 sm:$0xff]   ;;  %v5585_v2 = vld [vmem:[#allocation8 + $0xb48] ss:$16 sps:$4 sm:$0xff]  }
 0x1b4   :  { %v3314_v23 = vmul.f32 1.442695, %v3310_v17  ;;  %v3326_v62 = vmul.f32 1.442695, %v3322_v58  ;;  %5810 = vpow2.f32 %v3387_v0  ;;  %v3311_v24 = vsub.f32 %v6310_v31, %v3307_v15  ;;  %3213 = vmatpush1.bf16.msra.mxu1 %v5561_v13  ;;  %3132 = vmatprep.subr.bf16.mxu0 %v5566_v14  ;;  %v5590_v3 = vld [vmem:[#allocation8 + $0xb64] ss:$16 sps:$4 sm:$0xff]  }
 0x1b5   :  { %5812 = vpow2.f32 %v3399_v19  ;;  %v3318_v25 = vmul.f32 1.442695, %v3312_v9  ;;  %v3330_v26 = vmul.f32 1.442695, %v3324_v57  ;;  %v3323_v27 = vsub.f32 %v6345_v18, %v3307_v15  ;;  %3214 = vmatprep.subr.bf16.mxu1 %v5569_v52  ;;  %v5593_v10 = vld [vmem:[#allocation8 + $0xb6c] ss:$16 sps:$4 sm:$0xff]  }
 0x1b6   :  { %5814 = vpow2.f32 %v3314_v23  ;;  %v3391_v29 = vmul.f32 1.442695, %v3385_v51  ;;  %v3384_v30 = vsub.f32 %v6330_v45, %v6349_v60  ;;  %v3403_v32 = vmul.f32 1.442695, %v3397_v21  ;;  %v5581_v45 = vld [vmem:[#allocation8 + $0xb2c] ss:$16 sps:$4 sm:$0xff]  }
 0x1b7   :  { %5816 = vpow2.f32 %v3326_v62  ;;  %v3396_v31 = vsub.f32 %v6340_v42, %v6349_v60  ;;  %v3309_v33 = vmax.f32 %v6317_v34, %v3305_v4  ;;  %3133 = vmatpush1.bf16.msra.mxu0 %v5564_v1  ;;  %v3316_v36 = vmul.f32 1.442695, %v3311_v24  ;;  %v5588_v51 = vld [vmem:[#allocation8 + $0xb60] ss:$16 sps:$4 sm:$0xff]   ;;  %v5591_v52 = vld [vmem:[#allocation8 + $0xb68] ss:$16 sps:$4 sm:$0xff]  }
 0x1b8   :  { %5818 = vpow2.f32 %v3318_v25  ;;  %3215 = vmatpush1.bf16.msra.mxu1 %v5567_v22  ;;  %3134 = vmatprep.subr.bf16.mxu0 %v5572_v63  ;;  %v3328_v39 = vmul.f32 1.442695, %v3323_v27  ;;  %v3389_v61 = vmul.f32 1.442695, %v3384_v30  ;;  %v3386_v16 = vsub.f32 %v6333_v46, %v6355_v56  ;;  %v5587_v46 = vld [vmem:[#allocation8 + $0xb4c] ss:$16 sps:$4 sm:$0xff]  }
 0x1b9   :  { %5820 = vpow2.f32 %v3330_v26  ;;  %v3313_v40 = vsub.f32 %v6317_v34, %v3309_v33  ;;  %v3325_v41 = vsub.f32 %v3305_v4, %v3309_v33  ;;  %3216 = vmatprep.subr.bf16.mxu1 %v5575_v28  ;;  %v4846_v48 = vld [vmem:[%s6552_s2 + $0x20] sm:$0xff]  ;;  %v3401_v44 = vmul.f32 1.442695, %v3396_v31  ;;  %v4848_v43 = vld [vmem:[%s6552_s2 + $0x30] sm:$0xff]  ;;  %v5596_v17 = vld [vmem:[#allocation8 + $0xb84] ss:$16 sps:$4 sm:$0xff]  }
 0x1ba   :  { %5822 = vpow2.f32 %v3391_v29  ;;  %v3398_v34 = vsub.f32 %v6342_v55, %v6355_v56  ;;  %v3393_v59 = vmul.f32 1.442695, %v3386_v16  ;;  %v5599_v9 = vld [vmem:[#allocation8 + $0xb8c] ss:$16 sps:$4 sm:$0xff]   ;;  %v5594_v22 = vld [vmem:[#allocation8 + $0xb80] ss:$16 sps:$4 sm:$0xff]  }
 0x1bb   :  { %5824 = vpow2.f32 %v3403_v32  ;;  %3135 = vmatpush1.bf16.msra.mxu0 %v5570_v35  ;;  %v3320_v50 = vmul.f32 1.442695, %v3313_v40  ;;  %v3332_v47 = vmul.f32 1.442695, %v3325_v41  ;;  %v5597_v24 = vld [vmem:[#allocation8 + $0xb88] ss:$16 sps:$4 sm:$0xff]  }
 0x1bc   :  { %5826 = vpow2.f32 %v3316_v36  ;;  %3217 = vmatpush1.bf16.msra.mxu1 %v5573_v37  ;;  %3136 = vmatprep.subr.bf16.mxu0 %v5578_v38  ;;  %v3405_v56 = vmul.f32 1.442695, %v3398_v34  ;;  %v5602_v63 = vld [vmem:[#allocation8 + $0xba4] ss:$16 sps:$4 sm:$0xff]   ;;  %v5605_v27 = vld [vmem:[#allocation8 + $0xbac] ss:$16 sps:$4 sm:$0xff]  }
 0x1bd   :  { %5828 = vpow2.f32 %v3328_v39  ;;  %3218 = vmatprep.subr.bf16.mxu1 %v5581_v45  ;;  %v5600_v33 = vld [vmem:[#allocation8 + $0xba0] ss:$16 sps:$4 sm:$0xff]   ;;  %v5603_v37 = vld [vmem:[#allocation8 + $0xba8] ss:$16 sps:$4 sm:$0xff]   ;;  %v5608_v38 = vld [vmem:[#allocation8 + $0xbc4] ss:$16 sps:$4 sm:$0xff]  }
 0x1be   :  { %v6395_v42 = vpop.eup %5810  ;;  %5830 = vpow2.f32 %v3389_v61  ;;  %v5611_v40 = vld [vmem:[#allocation8 + $0xbcc] ss:$16 sps:$4 sm:$0xff]   ;;  %v5606_v16 = vld [vmem:[#allocation8 + $0xbc0] ss:$16 sps:$4 sm:$0xff]   ;;  %v5615_v34 = vld [vmem:[#allocation8 + $0xbe8] ss:$16 sps:$4 sm:$0xff]  }
 0x1bf   :  { %v6397_v18 = vpop.eup %5812  ;;  %v3423_v60 = vmul.f32 %v6395_v42, %v4846_v48  ;;  %5832 = vpow2.f32 %v3401_v44  ;;  %3137 = vmatpush1.bf16.msra.mxu0 %v5576_v49  ;;  %v5614_v44 = vld [vmem:[#allocation8 + $0xbe4] ss:$16 sps:$4 sm:$0xff]   ;;  %v5617_v49 = vld [vmem:[#allocation8 + $0xbec] ss:$16 sps:$4 sm:$0xff]  }
 0x1c0   :  { %v6400_v55 = vpop.eup %5814  ;;  %5834 = vpow2.f32 %v3320_v50  ;;  %3219 = vmatpush1.bf16.msra.mxu1 %v5579_v53  ;;  %3138 = vmatprep.subr.bf16.mxu0 %v5584_v54  ;;  %v5612_v50 = vld [vmem:[#allocation8 + $0xbe0] ss:$16 sps:$4 sm:$0xff]   ;;  %v5620_v53 = vld [vmem:[#allocation10 + $0x4] ss:$16 sps:$4 sm:$0xff]  }
 0x1c1   :  { %v6402_v6 = vpop.eup %5816  ;;  %v3346_v7 = vmul.f32 %v6400_v55, %v4846_v48  ;;  %v3427_v8 = vadd.f32 %v6397_v18, %v3423_v60  ;;  %5836 = vpow2.f32 %v3332_v47  ;;  %3220 = vmatprep.subr.bf16.mxu1 %v5587_v46  ;;  %v5609_v48 = vld [vmem:[#allocation8 + $0xbc8] ss:$16 sps:$4 sm:$0xff]   ;;  %v5623_v54 = vld [vmem:[#allocation10 + $0x204] ss:$16 sps:$4 sm:$0xff]   ;;  %v5006_v47 = vpack.c.bf16 %v6279_v5, %v6279_v5  ;;  %v5618_v46 = vld [vmem:[#allocation10] ss:$16 sps:$4 sm:$0xff]  }
 0x1c2   :  { %v6406_v11 = vpop.eup %5818  ;;  %5838 = vpow2.f32 %v3393_v59  ;;  %v5621_v59 = vld [vmem:[#allocation10 + $0x200] ss:$16 sps:$4 sm:$0xff]   ;;  %v5626_v60 = vld [vmem:[#allocation10 + $0x24] ss:$16 sps:$4 sm:$0xff]  }
 0x1c3   :  { %v6411_v12 = vpop.eup %5820  ;;  %v6414_v13 = vadd.f32 %v6402_v6, %v3346_v7  ;;  %4854 = vst [vmem:[%s6559_s9 + $0x20] sm:$0xff] %v3427_v8  ;;  %v3348_v14 = vmul.f32 %v6406_v11, %v4848_v43  ;;  %3139 = vmatpush1.bf16.msra.mxu0 %v5582_v20  ;;  %5840 = vpow2.f32 %v3405_v56  ;;  %v5629_v20 = vld [vmem:[#allocation10 + $0x224] ss:$16 sps:$4 sm:$0xff]   ;;  %v5624_v56 = vld [vmem:[#allocation10 + $0x20] ss:$16 sps:$4 sm:$0xff]  }
 0x1c4   :  { %v6420_v15 = vpop.eup %5822  ;;  %3221 = vmatpush1.bf16.msra.mxu1 %v5585_v2  ;;  %3140 = vmatprep.subr.bf16.mxu0 %v5590_v3  ;;  %v5627_v2 = vld [vmem:[#allocation10 + $0x220] ss:$16 sps:$4 sm:$0xff]   ;;  %v5632_v3 = vld [vmem:[#allocation10 + $0x44] ss:$16 sps:$4 sm:$0xff]  }
 0x1c5   :  { %v6422_v58 = vpop.eup %5824  ;;  %v6425_v0 = vadd.f32 %v6411_v12, %v3348_v14  ;;  %v3425_v19 = vmul.f32 %v6420_v15, %v4848_v43  ;;  %3222 = vmatprep.subr.bf16.mxu1 %v5593_v10  ;;  %v5635_v7 = vld [vmem:[#allocation10 + $0x244] ss:$16 sps:$4 sm:$0xff]   ;;  %v5630_v5 = vld [vmem:[#allocation10 + $0x40] ss:$16 sps:$4 sm:$0xff]  }
 0x1c6   :  { %v6428_v57 = vpop.eup %5826  ;;  %v5633_v8 = vld [vmem:[#allocation10 + $0x240] ss:$16 sps:$4 sm:$0xff]   ;;  %v5638_v10 = vld [vmem:[#allocation10 + $0x64] ss:$16 sps:$4 sm:$0xff]  }
 0x1c7   :  { %v6433_v4 = vpop.eup %5828  ;;  %v3429_v1 = vadd.f32 %v6422_v58, %v3425_v19  ;;  %3141 = vmatpush1.bf16.msra.mxu0 %v5588_v51  ;;  %v5641_v43 = vld [vmem:[#allocation10 + $0x264] ss:$16 sps:$4 sm:$0xff]   ;;  %v5636_v14 = vld [vmem:[#allocation10 + $0x60] ss:$16 sps:$4 sm:$0xff]  }
 0x1c8   :  { %v6437_v62 = vpop.eup %5830  ;;  %3223 = vmatpush1.bf16.msra.mxu1 %v5591_v52  ;;  %3142 = vmatprep.subr.bf16.mxu0 %v5596_v17  ;;  %v5639_v51 = vld [vmem:[#allocation10 + $0x260] ss:$16 sps:$4 sm:$0xff]   ;;  %v5644_v52 = vld [vmem:[#allocation10 + $0x84] ss:$16 sps:$4 sm:$0xff]  }
 0x1c9   :  { %v6439_v25 = vpop.eup %5832  ;;  %3224 = vmatprep.subr.bf16.mxu1 %v5599_v9  ;;  %v5647_v17 = vld [vmem:[#allocation10 + $0x284] ss:$16 sps:$4 sm:$0xff]   ;;  %v5642_v19 = vld [vmem:[#allocation10 + $0x80] ss:$16 sps:$4 sm:$0xff]  }
 0x1ca   :  { %v4847_v21 = vld [vmem:[%s6552_s2 + $0x28] sm:$0xff]  ;;  %v6448_v29 = vpop.eup %5834  ;;  %v5645_v9 = vld [vmem:[#allocation10 + $0x280] ss:$16 sps:$4 sm:$0xff]  }
 0x1cb   :  { %v3347_v23 = vmul.f32 %v6428_v57, %v4847_v21  ;;  %4856 = vst [vmem:[%s6559_s9 + $0x30] sm:$0xff] %v3429_v1  ;;  %v3424_v26 = vmul.f32 %v6437_v62, %v4847_v21  ;;  %v6453_v32 = vpop.eup %5836  ;;  %3143 = vmatpush1.bf16.msra.mxu0 %v5594_v22  ;;  %v5650_v21 = vld [vmem:[#allocation10 + $0xa4] ss:$16 sps:$4 sm:$0xff]   ;;  %v5648_v22 = vld [vmem:[#allocation10 + $0xa0] ss:$16 sps:$4 sm:$0xff]  }
 0x1cc   :  { %v6457_v36 = vpop.eup %5838  ;;  %3225 = vmatpush1.bf16.msra.mxu1 %v5597_v24  ;;  %3144 = vmatprep.subr.bf16.mxu0 %v5602_v63  ;;  %v5653_v1 = vld [vmem:[#allocation10 + $0x2a4] ss:$16 sps:$4 sm:$0xff]  }
 0x1cd   :  { %v6446_v28 = vadd.f32 %v6433_v4, %v3347_v23  ;;  %v3428_v31 = vadd.f32 %v6439_v25, %v3424_v26  ;;  %3226 = vmatprep.subr.bf16.mxu1 %v5605_v27  ;;  %v6466_v45 = vpop.eup %5840  ;;  %v5651_v23 = vld [vmem:[#allocation10 + $0x2a0] ss:$16 sps:$4 sm:$0xff]   ;;  %v5656_v24 = vld [vmem:[#allocation10 + $0xc4] ss:$16 sps:$4 sm:$0xff]  }
 0x1ce   :  { %v5659_v63 = vld [vmem:[#allocation10 + $0x2c4] ss:$16 sps:$4 sm:$0xff]   ;;  %v5654_v26 = vld [vmem:[#allocation10 + $0xc0] ss:$16 sps:$4 sm:$0xff]  }
 0x1cf   :  { %3145 = vmatpush1.bf16.msra.mxu0 %v5600_v33  ;;  %v5657_v27 = vld [vmem:[#allocation10 + $0x2c0] ss:$16 sps:$4 sm:$0xff]  }
 0x1d0   :  { %3227 = vmatpush1.bf16.msra.mxu1 %v5603_v37  ;;  %3146 = vmatprep.subr.bf16.mxu0 %v5608_v38  ;;  %v5660_v33 = vld [vmem:[#allocation10 + $0xe0] ss:$16 sps:$4 sm:$0xff]  }
 0x1d1   :  { %3228 = vmatprep.subr.bf16.mxu1 %v5611_v40 }
 0x1d2   :  { %v4849_v30 = vld [vmem:[%s6552_s2 + $0x38] sm:$0xff] }
 0x1d3   :  { %v3349_v35 = vmul.f32 %v6448_v29, %v4849_v30  ;;  %4855 = vst [vmem:[%s6559_s9 + $0x28] sm:$0xff] %v3428_v31  ;;  %v3426_v39 = vmul.f32 %v6457_v36, %v4849_v30  ;;  %3147 = vmatpush1.bf16.msra.mxu0 %v5606_v16  ;;  %v5662_v30 = vld [vmem:[#allocation10 + $0xe4] ss:$16 sps:$4 sm:$0xff]  }
 0x1d4   :  { %3229 = vmatpush1.bf16.msra.mxu1 %v5609_v48  ;;  %3148 = vmatprep.subr.bf16.mxu0 %v5614_v44  ;;  %v5665_v31 = vld [vmem:[#allocation10 + $0x2e4] ss:$16 sps:$4 sm:$0xff]  }
 0x1d5   :  { %v6464_v41 = vadd.f32 %v6453_v32, %v3349_v35  ;;  %v3430_v61 = vadd.f32 %v6466_v45, %v3426_v39  ;;  %3230 = vmatprep.subr.bf16.mxu1 %v5617_v49  ;;  %v5663_v35 = vld [vmem:[#allocation10 + $0x2e0] ss:$16 sps:$4 sm:$0xff]  }
 0x1d7   :  { %4857 = vst [vmem:[%s6559_s9 + $0x38] sm:$0xff] %v3430_v61  ;;  %3149 = vmatpush1.bf16.msra.mxu0 %v5612_v50 }
 0x1d8   :  { %3231 = vmatpush1.bf16.msra.mxu1 %v5615_v34  ;;  %4229 = vmatprep.subr.bf16.mxu0 %v5620_v53 }
 0x1d9   :  { %4270 = vmatprep.subr.bf16.mxu1 %v5623_v54 }
 0x1da   :  { %3151 = vmatmul.mubr.bf16.vlgmr.msra.gmra.mrb[8].mxu0 %v5006_v47 }
 0x1db   :  { %3233 = vmatmul.mubr.bf16.vlgmr.msra.gmra.mrb[8].mxu1 %v5006_v47  ;;  %4230 = vmatpush1.bf16.msra.mxu0 %v5618_v46 }
 0x1dc   :  { %4271 = vmatpush1.bf16.msra.mxu1 %v5621_v59  ;;  %4231 = vmatprep.subr.bf16.mxu0 %v5626_v60 }
 0x1dd   :  { %4272 = vmatprep.subr.bf16.mxu1 %v5629_v20 }
 0x1de   :  { %v3265_v37 = vld [vmem:[%s6552_s2] sm:$0xff]  ;;  %v3267_v38 = vld [vmem:[%s6552_s2 + $0x10] sm:$0xff]  ;;  %v3266_v39 = vld [vmem:[%s6552_s2 + $0x8] sm:$0xff] }
 0x1df   :  { %4232 = vmatpush1.bf16.msra.mxu0 %v5624_v56  ;;  %v3268_v40 = vld [vmem:[%s6552_s2 + $0x18] sm:$0xff]  ;;  %v3334_v61 = vmul.f32 %v6400_v55, %v3265_v37  ;;  %v3407_v16 = vmul.f32 %v6395_v42, %v3265_v37  ;;  %v3336_v48 = vmul.f32 %v6406_v11, %v3267_v38  ;;  %v3409_v44 = vmul.f32 %v6420_v15, %v3267_v38 }
 0x1e0   :  { %4273 = vmatpush1.bf16.msra.mxu1 %v5627_v2  ;;  %4233 = vmatprep.subr.bf16.mxu0 %v5632_v3  ;;  %v3335_v34 = vmul.f32 %v6428_v57, %v3266_v39  ;;  %v3408_v53 = vmul.f32 %v6437_v62, %v3266_v39  ;;  %v3337_v54 = vmul.f32 %v6448_v29, %v3268_v40  ;;  %v5704_v37 = vld [vmem:[#allocation10 + $0x1c4] ss:$16 sps:$4 sm:$0xff]   ;;  %v5702_v39 = vld [vmem:[#allocation10 + $0x1c0] ss:$16 sps:$4 sm:$0xff]  }
 0x1e1   :  { %4274 = vmatprep.subr.bf16.mxu1 %v5635_v7  ;;  %v3410_v47 = vmul.f32 %v6457_v36, %v3268_v40  ;;  %v5707_v38 = vld [vmem:[#allocation10 + $0x3c4] ss:$16 sps:$4 sm:$0xff]   ;;  %v5705_v40 = vld [vmem:[#allocation10 + $0x3c0] ss:$16 sps:$4 sm:$0xff]  }
 0x1e3   :  { %4234 = vmatpush1.bf16.msra.mxu0 %v5630_v5  ;;  %v5666_v5 = vld [vmem:[#allocation10 + $0x100] ss:$16 sps:$4 sm:$0xff]  }
 0x1e4   :  { %4275 = vmatpush1.bf16.msra.mxu1 %v5633_v8  ;;  %4235 = vmatprep.subr.bf16.mxu0 %v5638_v10  ;;  %v5669_v8 = vld [vmem:[#allocation10 + $0x300] ss:$16 sps:$4 sm:$0xff]   ;;  %v5674_v10 = vld [vmem:[#allocation10 + $0x124] ss:$16 sps:$4 sm:$0xff]  }
 0x1e5   :  { %4276 = vmatprep.subr.bf16.mxu1 %v5641_v43  ;;  %v5677_v43 = vld [vmem:[#allocation10 + $0x324] ss:$16 sps:$4 sm:$0xff]  }
 0x1e7   :  { %4236 = vmatpush1.bf16.msra.mxu0 %v5636_v14  ;;  %v5672_v14 = vld [vmem:[#allocation10 + $0x120] ss:$16 sps:$4 sm:$0xff]  }
 0x1e8   :  { %4277 = vmatpush1.bf16.msra.mxu1 %v5639_v51  ;;  %4237 = vmatprep.subr.bf16.mxu0 %v5644_v52  ;;  %v5675_v51 = vld [vmem:[#allocation10 + $0x320] ss:$16 sps:$4 sm:$0xff]   ;;  %v5680_v52 = vld [vmem:[#allocation10 + $0x144] ss:$16 sps:$4 sm:$0xff]  }
 0x1e9   :  { %4278 = vmatprep.subr.bf16.mxu1 %v5647_v17  ;;  %v5683_v17 = vld [vmem:[#allocation10 + $0x344] ss:$16 sps:$4 sm:$0xff]  }
 0x1eb   :  { %4238 = vmatpush1.bf16.msra.mxu0 %v5642_v19  ;;  %v5678_v19 = vld [vmem:[#allocation10 + $0x140] ss:$16 sps:$4 sm:$0xff]  }
 0x1ec   :  { %4279 = vmatpush1.bf16.msra.mxu1 %v5645_v9  ;;  %4239 = vmatprep.subr.bf16.mxu0 %v5650_v21  ;;  %v5681_v9 = vld [vmem:[#allocation10 + $0x340] ss:$16 sps:$4 sm:$0xff]   ;;  %v5686_v21 = vld [vmem:[#allocation10 + $0x164] ss:$16 sps:$4 sm:$0xff]  }
 0x1ed   :  { %4280 = vmatprep.subr.bf16.mxu1 %v5653_v1  ;;  %v5689_v1 = vld [vmem:[#allocation10 + $0x364] ss:$16 sps:$4 sm:$0xff]  }
 0x1ef   :  { %4240 = vmatpush1.bf16.msra.mxu0 %v5648_v22  ;;  %v5684_v22 = vld [vmem:[#allocation10 + $0x160] ss:$16 sps:$4 sm:$0xff]  }
 0x1f0   :  { %4281 = vmatpush1.bf16.msra.mxu1 %v5651_v23  ;;  %4241 = vmatprep.subr.bf16.mxu0 %v5656_v24  ;;  %v5687_v23 = vld [vmem:[#allocation10 + $0x360] ss:$16 sps:$4 sm:$0xff]   ;;  %v5692_v24 = vld [vmem:[#allocation10 + $0x184] ss:$16 sps:$4 sm:$0xff]  }
 0x1f1   :  { %4282 = vmatprep.subr.bf16.mxu1 %v5659_v63  ;;  %v5695_v63 = vld [vmem:[#allocation10 + $0x384] ss:$16 sps:$4 sm:$0xff]  }
 0x1f3   :  { %4242 = vmatpush1.bf16.msra.mxu0 %v5654_v26  ;;  %v5690_v26 = vld [vmem:[#allocation10 + $0x180] ss:$16 sps:$4 sm:$0xff]  }
 0x1f4   :  { %4283 = vmatpush1.bf16.msra.mxu1 %v5657_v27  ;;  %4243 = vmatprep.subr.bf16.mxu0 %v5662_v30  ;;  %v5693_v27 = vld [vmem:[#allocation10 + $0x380] ss:$16 sps:$4 sm:$0xff]   ;;  %v5698_v30 = vld [vmem:[#allocation10 + $0x1a4] ss:$16 sps:$4 sm:$0xff]  }
 0x1f5   :  { %4284 = vmatprep.subr.bf16.mxu1 %v5665_v31  ;;  %v5701_v31 = vld [vmem:[#allocation10 + $0x3a4] ss:$16 sps:$4 sm:$0xff]  }
 0x1f7   :  { %4244 = vmatpush1.bf16.msra.mxu0 %v5660_v33  ;;  %v5696_v33 = vld [vmem:[#allocation10 + $0x1a0] ss:$16 sps:$4 sm:$0xff]  }
 0x1f8   :  { %4285 = vmatpush1.bf16.msra.mxu1 %v5663_v35  ;;  %v5699_v35 = vld [vmem:[#allocation10 + $0x3a0] ss:$16 sps:$4 sm:$0xff]  }
 0x22d   :  { %v2205_v49 = vpop.f32.mrb[4].mxu0  ;;  %v2287_v50 = vpop.f32.mrb[4].mxu1 }
 0x22e   :  { %v3338_v46 = vmul.f32 %v6402_v6, %v2205_v49  ;;  %v3411_v55 = vmul.f32 %v6397_v18, %v2205_v49  ;;  %v3340_v42 = vmul.f32 %v6411_v12, %v2287_v50  ;;  %v3413_v11 = vmul.f32 %v6422_v58, %v2287_v50  ;;  %v2207_v59 = vpop.f32.mrb[5].mxu0  ;;  %v2289_v15 = vpop.f32.mrb[5].mxu1  ;;  %v5716_v49 = vld [vmem:[#allocation10 + $0xc] ss:$16 sps:$4 sm:$0xff]  }
 0x22f   :  { %v3339_v60 = vmul.f32 %v6433_v4, %v2207_v59  ;;  %v3412_v57 = vmul.f32 %v6439_v25, %v2207_v59  ;;  %v3341_v62 = vmul.f32 %v6453_v32, %v2289_v15  ;;  %v3414_v29 = vmul.f32 %v6466_v45, %v2289_v15  ;;  %v2209_v20 = vpop.f32.mrb[6].mxu0  ;;  %v2291_v36 = vpop.f32.mrb[6].mxu1  ;;  %v5668_v32 = vld [vmem:[#allocation10 + $0x104] ss:$16 sps:$4 sm:$0xff]   ;;  %v5719_v50 = vld [vmem:[#allocation10 + $0x20c] ss:$16 sps:$4 sm:$0xff]  }
 0x230   :  { %v6502_v56 = vadd.f32 %v3338_v46, %v3334_v61  ;;  %v3415_v6 = vadd.f32 %v3411_v55, %v3407_v16  ;;  %v6504_v18 = vadd.f32 %v3340_v42, %v3336_v48  ;;  %v3417_v12 = vadd.f32 %v3413_v11, %v3409_v44  ;;  %v2210_v2 = vpop.f32.mrb[7].mxu0  ;;  %v2292_v58 = vpop.f32.mrb[7].mxu1  ;;  %v5671_v45 = vld [vmem:[#allocation10 + $0x304] ss:$16 sps:$4 sm:$0xff]   ;;  %4245 = vmatprep.subr.bf16.mxu0 %v5668_v32  ;;  %v5708_v48 = vld [vmem:[#allocation10 + $0x1e0] ss:$16 sps:$4 sm:$0xff]  }
 0x231   :  { %v6506_v3 = vadd.f32 %v3339_v60, %v3335_v34  ;;  %v3416_v7 = vadd.f32 %v3412_v57, %v3408_v53  ;;  %v6508_v4 = vadd.f32 %v3341_v62, %v3337_v54  ;;  %v3418_v25 = vadd.f32 %v3414_v29, %v3410_v47  ;;  %4286 = vmatprep.subr.bf16.mxu1 %v5671_v45  ;;  %v5710_v61 = vld [vmem:[#allocation10 + $0x1e4] ss:$16 sps:$4 sm:$0xff]   ;;  %v5711_v44 = vld [vmem:[#allocation10 + $0x3e0] ss:$16 sps:$4 sm:$0xff]  }
 0x232   :  { %3419 = vst [vmem:[%s6559_s9] sm:$0xff] %v3415_v6  ;;  %3421 = vst [vmem:[%s6559_s9 + $0x10] sm:$0xff] %v3417_v12  ;;  %4246 = vmatpush1.bf16.msra.mxu0 %v5666_v5  ;;  %4287 = vmatpush1.bf16.msra.mxu1 %v5669_v8  ;;  %v5713_v16 = vld [vmem:[#allocation10 + $0x3e4] ss:$16 sps:$4 sm:$0xff]  }
 0x233   :  { %3420 = vst [vmem:[%s6559_s9 + $0x8] sm:$0xff] %v3416_v7  ;;  %3422 = vst [vmem:[%s6559_s9 + $0x18] sm:$0xff] %v3418_v25  ;;  %4247 = vmatprep.subr.bf16.mxu0 %v5674_v10  ;;  %4288 = vmatprep.subr.bf16.mxu1 %v5677_v43 }
 0x236   :  { %4248 = vmatpush1.bf16.msra.mxu0 %v5672_v14  ;;  %4289 = vmatpush1.bf16.msra.mxu1 %v5675_v51 }
 0x237   :  { %4249 = vmatprep.subr.bf16.mxu0 %v5680_v52  ;;  %4290 = vmatprep.subr.bf16.mxu1 %v5683_v17 }
 0x23a   :  { %4250 = vmatpush1.bf16.msra.mxu0 %v5678_v19  ;;  %4291 = vmatpush1.bf16.msra.mxu1 %v5681_v9  ;;  %v5714_v9 = vld [vmem:[#allocation10 + $0x8] ss:$16 sps:$4 sm:$0xff]  }
 0x23b   :  { %4251 = vmatprep.subr.bf16.mxu0 %v5686_v21  ;;  %4292 = vmatprep.subr.bf16.mxu1 %v5689_v1  ;;  %v5717_v1 = vld [vmem:[#allocation10 + $0x208] ss:$16 sps:$4 sm:$0xff]  }
 0x23e   :  { %4252 = vmatpush1.bf16.msra.mxu0 %v5684_v22  ;;  %4293 = vmatpush1.bf16.msra.mxu1 %v5687_v23  ;;  %v5723_v23 = vld [vmem:[#allocation10 + $0x228] ss:$16 sps:$4 sm:$0xff]  }
 0x23f   :  { %4253 = vmatprep.subr.bf16.mxu0 %v5692_v24  ;;  %4294 = vmatprep.subr.bf16.mxu1 %v5695_v63  ;;  %v5728_v24 = vld [vmem:[#allocation10 + $0x4c] ss:$16 sps:$4 sm:$0xff]  }
 0x240   :  { %v5731_v63 = vld [vmem:[#allocation10 + $0x24c] ss:$16 sps:$4 sm:$0xff]  }
 0x242   :  { %4254 = vmatpush1.bf16.msra.mxu0 %v5690_v26  ;;  %4295 = vmatpush1.bf16.msra.mxu1 %v5693_v27  ;;  %v5726_v26 = vld [vmem:[#allocation10 + $0x48] ss:$16 sps:$4 sm:$0xff]  }
 0x243   :  { %4255 = vmatprep.subr.bf16.mxu0 %v5698_v30  ;;  %4296 = vmatprep.subr.bf16.mxu1 %v5701_v31  ;;  %v5729_v27 = vld [vmem:[#allocation10 + $0x248] ss:$16 sps:$4 sm:$0xff]   ;;  %v5734_v30 = vld [vmem:[#allocation10 + $0x6c] ss:$16 sps:$4 sm:$0xff]  }
 0x244   :  { %v5737_v31 = vld [vmem:[#allocation10 + $0x26c] ss:$16 sps:$4 sm:$0xff]  }
 0x246   :  { %4256 = vmatpush1.bf16.msra.mxu0 %v5696_v33  ;;  %4297 = vmatpush1.bf16.msra.mxu1 %v5699_v35  ;;  %v5732_v33 = vld [vmem:[#allocation10 + $0x68] ss:$16 sps:$4 sm:$0xff]  }
 0x247   :  { %4257 = vmatprep.subr.bf16.mxu0 %v5704_v37  ;;  %4298 = vmatprep.subr.bf16.mxu1 %v5707_v38  ;;  %v5735_v35 = vld [vmem:[#allocation10 + $0x268] ss:$16 sps:$4 sm:$0xff]   ;;  %v5740_v37 = vld [vmem:[#allocation10 + $0x8c] ss:$16 sps:$4 sm:$0xff]  }
 0x248   :  { %v5743_v38 = vld [vmem:[#allocation10 + $0x28c] ss:$16 sps:$4 sm:$0xff]  }
 0x24a   :  { %4258 = vmatpush1.bf16.msra.mxu0 %v5702_v39  ;;  %4299 = vmatpush1.bf16.msra.mxu1 %v5705_v40  ;;  %v5738_v39 = vld [vmem:[#allocation10 + $0x88] ss:$16 sps:$4 sm:$0xff]  }
 0x24b   :  { %4259 = vmatprep.subr.bf16.mxu0 %v5710_v61  ;;  %4300 = vmatprep.subr.bf16.mxu1 %v5713_v16  ;;  %v5741_v40 = vld [vmem:[#allocation10 + $0x288] ss:$16 sps:$4 sm:$0xff]   ;;  %v5746_v61 = vld [vmem:[#allocation10 + $0xac] ss:$16 sps:$4 sm:$0xff]  }
 0x24c   :  { %v5749_v16 = vld [vmem:[#allocation10 + $0x2ac] ss:$16 sps:$4 sm:$0xff]  }
 0x24e   :  { %4260 = vmatpush1.bf16.msra.mxu0 %v5708_v48  ;;  %4301 = vmatpush1.bf16.msra.mxu1 %v5711_v44  ;;  %v5744_v48 = vld [vmem:[#allocation10 + $0xa8] ss:$16 sps:$4 sm:$0xff]  }
 0x24f   :  { %4311 = vmatprep.subr.bf16.mxu0 %v5716_v49  ;;  %4352 = vmatprep.subr.bf16.mxu1 %v5719_v50  ;;  %v5747_v44 = vld [vmem:[#allocation10 + $0x2a8] ss:$16 sps:$4 sm:$0xff]   ;;  %v5752_v49 = vld [vmem:[#allocation10 + $0xcc] ss:$16 sps:$4 sm:$0xff]  }
 0x250   :  { %v5755_v50 = vld [vmem:[#allocation10 + $0x2cc] ss:$16 sps:$4 sm:$0xff]  }
 0x2ad   :  { %v3152_v34 = vpop.f32.mrb[8].mxu0 }
 0x2ae   :  { %v4842_v53 = vmul.f32 -1.442695, %v3152_v34  ;;  %v3234_v54 = vpop.f32.mrb[8].mxu1  ;;  %v3154_v47 = vpop.f32.mrb[9].mxu0  ;;  %v5750_v34 = vld [vmem:[#allocation10 + $0xc8] ss:$16 sps:$4 sm:$0xff]  }
 0x2af   :  { %v4844_v46 = vmul.f32 -1.442695, %v3234_v54  ;;  %v4843_v55 = vmul.f32 -1.442695, %v3154_v47  ;;  %v3236_v42 = vpop.f32.mrb[9].mxu1  ;;  %v3156_v11 = vpop.f32.mrb[10].mxu0 }
 0x2b0   :  { %5842 = vpow2.f32 %v4842_v53  ;;  %v4845_v59 = vmul.f32 -1.442695, %v3236_v42  ;;  %v3238_v15 = vpop.f32.mrb[10].mxu1  ;;  %v3157_v60 = vpop.f32.mrb[11].mxu0  ;;  %v5753_v53 = vld [vmem:[#allocation10 + $0x2c8] ss:$16 sps:$4 sm:$0xff]  }
 0x2b1   :  { %5844 = vpow2.f32 %v4844_v46  ;;  %v3239_v57 = vpop.f32.mrb[11].mxu1  ;;  %v5758_v54 = vld [vmem:[#allocation10 + $0xec] ss:$16 sps:$4 sm:$0xff]   ;;  %v5756_v46 = vld [vmem:[#allocation10 + $0xe8] ss:$16 sps:$4 sm:$0xff]  }
 0x2b2   :  { %5846 = vpow2.f32 %v4843_v55  ;;  %v5761_v47 = vld [vmem:[#allocation10 + $0x2ec] ss:$16 sps:$4 sm:$0xff]   ;;  %v5759_v55 = vld [vmem:[#allocation10 + $0x2e8] ss:$16 sps:$4 sm:$0xff]  }
 0x2b3   :  { %5848 = vpow2.f32 %v4845_v59  ;;  %v5764_v42 = vld [vmem:[#allocation10 + $0x10c] ss:$16 sps:$4 sm:$0xff]   ;;  %v5762_v59 = vld [vmem:[#allocation10 + $0x108] ss:$16 sps:$4 sm:$0xff]  }
 0x2b4   :  { %5850 = vrcp.f32 %v6414_v13  ;;  %v5767_v11 = vld [vmem:[#allocation10 + $0x30c] ss:$16 sps:$4 sm:$0xff]   ;;  %v5765_v15 = vld [vmem:[#allocation10 + $0x308] ss:$16 sps:$4 sm:$0xff]  }
 0x2b5   :  { %5852 = vrcp.f32 %v6425_v0  ;;  %v5770_v60 = vld [vmem:[#allocation10 + $0x12c] ss:$16 sps:$4 sm:$0xff]  }
 0x2b6   :  { %v5773_v57 = vld [vmem:[#allocation10 + $0x32c] ss:$16 sps:$4 sm:$0xff]  }
 0x2ba   :  { %v5843_v62 = vpop.eup %5842 }
 0x2bb   :  { %v5845_v29 = vpop.eup %5844  ;;  %v3253_v20 = vadd.f32 1.0, %v5843_v62  ;;  %v5768_v62 = vld [vmem:[#allocation10 + $0x128] ss:$16 sps:$4 sm:$0xff]  }
 0x2bc   :  { %v5847_v36 = vpop.eup %5846  ;;  %v3255_v6 = vadd.f32 1.0, %v5845_v29  ;;  %v5771_v29 = vld [vmem:[#allocation10 + $0x328] ss:$16 sps:$4 sm:$0xff]  }
 0x2bd   :  { %v5849_v12 = vpop.eup %5848  ;;  %5854 = vrcp.f32 %v3253_v20  ;;  %v3254_v2 = vadd.f32 1.0, %v5847_v36  ;;  %v5776_v20 = vld [vmem:[#allocation10 + $0x14c] ss:$16 sps:$4 sm:$0xff]  }
 0x2be   :  { %5856 = vrcp.f32 %v3255_v6  ;;  %v3256_v58 = vadd.f32 1.0, %v5849_v12  ;;  %v5851_v7 = vpop.eup %5850  ;;  %v5779_v36 = vld [vmem:[#allocation10 + $0x34c] ss:$16 sps:$4 sm:$0xff]   ;;  %v5774_v6 = vld [vmem:[#allocation10 + $0x148] ss:$16 sps:$4 sm:$0xff]  }
 0x2bf   :  { %5858 = vrcp.f32 %v3254_v2  ;;  %v5853_v25 = vpop.eup %5852  ;;  %v5777_v12 = vld [vmem:[#allocation10 + $0x348] ss:$16 sps:$4 sm:$0xff]   ;;  %v5782_v2 = vld [vmem:[#allocation10 + $0x16c] ss:$16 sps:$4 sm:$0xff]  }
 0x2c0   :  { %5860 = vrcp.f32 %v3256_v58  ;;  %v5785_v58 = vld [vmem:[#allocation10 + $0x36c] ss:$16 sps:$4 sm:$0xff]  }
 0x2c1   :  { %5862 = vrcp.f32 %v6446_v28 }
 0x2c2   :  { %5864 = vrcp.f32 %v6464_v41 }
 0x2c7   :  { %v5855_v32 = vpop.eup %5854 }
 0x2c8   :  { %v5857_v13 = vpop.eup %5856  ;;  %v3441_v45 = vmul.f32 %v5855_v32, %v6502_v56  ;;  %v5788_v32 = vld [vmem:[#allocation10 + $0x18c] ss:$16 sps:$4 sm:$0xff]  }
 0x2c9   :  { %v5859_v5 = vpop.eup %5858  ;;  %v3443_v0 = vmul.f32 %v5857_v13, %v6504_v18  ;;  %v5722_v18 = vld [vmem:[#allocation10 + $0x2c] ss:$16 sps:$4 sm:$0xff]  }
 0x2ca   :  { %v5861_v8 = vpop.eup %5860  ;;  %v3442_v10 = vmul.f32 %v5859_v5, %v6506_v3  ;;  %v3449_v43 = vmul.f32 %v5851_v7, %v3441_v45  ;;  %v5725_v3 = vld [vmem:[#allocation10 + $0x22c] ss:$16 sps:$4 sm:$0xff]   ;;  %v5780_v7 = vld [vmem:[#allocation10 + $0x168] ss:$16 sps:$4 sm:$0xff]  }
 0x2cb   :  { %v5863_v14 = vpop.eup %5862  ;;  %v3444_v51 = vmul.f32 %v5861_v8, %v6508_v4  ;;  %v3451_v52 = vmul.f32 %v5853_v25, %v3443_v0  ;;  %v5720_v4 = vld [vmem:[#allocation10 + $0x28] ss:$16 sps:$4 sm:$0xff]   ;;  %v5791_v13 = vld [vmem:[#allocation10 + $0x38c] ss:$16 sps:$4 sm:$0xff]  }
 0x2cc   :  { %v5865_v28 = vpop.eup %5864  ;;  %v3450_v17 = vmul.f32 %v5863_v14, %v3442_v10  ;;  %v6530_v22 = vpack.c.bf16 %v3449_v43, %v3449_v43  ;;  %v5783_v25 = vld [vmem:[#allocation10 + $0x368] ss:$16 sps:$4 sm:$0xff]   ;;  %v5794_v0 = vld [vmem:[#allocation10 + $0x1ac] ss:$16 sps:$4 sm:$0xff]  }
 0x2cd   :  { %v3452_v41 = vmul.f32 %v5865_v28, %v3444_v51  ;;  %v6532_v56 = vpack.c.bf16 %v3451_v52, %v3451_v52  ;;  %v5786_v45 = vld [vmem:[#allocation10 + $0x188] ss:$16 sps:$4 sm:$0xff]   ;;  %v5797_v8 = vld [vmem:[#allocation10 + $0x3ac] ss:$16 sps:$4 sm:$0xff]  }
 0x2ce   :  { %v3454_v19 = vpack.c.bf16 %v3450_v17, %v3450_v17  ;;  %v5789_v5 = vld [vmem:[#allocation10 + $0x388] ss:$16 sps:$4 sm:$0xff]   ;;  %v5800_v14 = vld [vmem:[#allocation10 + $0x1cc] ss:$16 sps:$4 sm:$0xff]  }
 0x2cf   :  { %v3456_v21 = vpack.c.bf16 %v3452_v41, %v3452_v41  ;;  %v5792_v10 = vld [vmem:[#allocation10 + $0x1a8] ss:$16 sps:$4 sm:$0xff]   ;;  %v5803_v51 = vld [vmem:[#allocation10 + $0x3cc] ss:$16 sps:$4 sm:$0xff]  }
 0x2d0   :  { %4261 = vmatprep.mubr.bf16.mxu0 %v3454_v19  ;;  %v5795_v43 = vld [vmem:[#allocation10 + $0x3a8] ss:$16 sps:$4 sm:$0xff]   ;;  %v5806_v17 = vld [vmem:[#allocation10 + $0x1ec] ss:$16 sps:$4 sm:$0xff]  }
 0x2d1   :  { %4302 = vmatprep.mubr.bf16.mxu1 %v3456_v21  ;;  %4262 = vmatmul.mubr.bf16.vlgmr.msra.gmra.mrb[12].mxu0 %v6530_v22  ;;  %v5798_v52 = vld [vmem:[#allocation10 + $0x1c8] ss:$16 sps:$4 sm:$0xff]   ;;  %v5809_v41 = vld [vmem:[#allocation10 + $0x3ec] ss:$16 sps:$4 sm:$0xff]  }
 0x2d2   :  { %4303 = vmatmul.mubr.bf16.vlgmr.msra.gmra.mrb[12].mxu1 %v6532_v56  ;;  %4312 = vmatpush1.bf16.msra.mxu0 %v5714_v9  ;;  %v5801_v28 = vld [vmem:[#allocation10 + $0x3c8] ss:$16 sps:$4 sm:$0xff]  }
 0x2d3   :  { %4353 = vmatpush1.bf16.msra.mxu1 %v5717_v1  ;;  %4343 = vmatprep.mubr.bf16.mxu0 %v3454_v19  ;;  %v5804_v19 = vld [vmem:[#allocation10 + $0x1e8] ss:$16 sps:$4 sm:$0xff]  }
 0x2d4   :  { %4384 = vmatprep.mubr.bf16.mxu1 %v3456_v21  ;;  %4313 = vmatprep.subr.bf16.mxu0 %v5722_v18  ;;  %v5807_v9 = vld [vmem:[#allocation10 + $0x3e8] ss:$16 sps:$4 sm:$0xff]  }
 0x2d5   :  { %4354 = vmatprep.subr.bf16.mxu1 %v5725_v3 }
 0x2d6   :  { %4314 = vmatpush1.bf16.msra.mxu0 %v5720_v4 }
 0x2d7   :  { %4355 = vmatpush1.bf16.msra.mxu1 %v5723_v23  ;;  %4315 = vmatprep.subr.bf16.mxu0 %v5728_v24 }
 0x2d8   :  { %4356 = vmatprep.subr.bf16.mxu1 %v5731_v63 }
 0x2da   :  { %4316 = vmatpush1.bf16.msra.mxu0 %v5726_v26 }
 0x2db   :  { %4357 = vmatpush1.bf16.msra.mxu1 %v5729_v27  ;;  %4317 = vmatprep.subr.bf16.mxu0 %v5734_v30 }
 0x2dc   :  { %4358 = vmatprep.subr.bf16.mxu1 %v5737_v31 }
 0x2de   :  { %4318 = vmatpush1.bf16.msra.mxu0 %v5732_v33 }
 0x2df   :  { %4359 = vmatpush1.bf16.msra.mxu1 %v5735_v35  ;;  %4319 = vmatprep.subr.bf16.mxu0 %v5740_v37 }
 0x2e0   :  { %4360 = vmatprep.subr.bf16.mxu1 %v5743_v38 }
 0x2e2   :  { %4320 = vmatpush1.bf16.msra.mxu0 %v5738_v39 }
 0x2e3   :  { %4361 = vmatpush1.bf16.msra.mxu1 %v5741_v40  ;;  %4321 = vmatprep.subr.bf16.mxu0 %v5746_v61 }
 0x2e4   :  { %4362 = vmatprep.subr.bf16.mxu1 %v5749_v16 }
 0x2e6   :  { %4322 = vmatpush1.bf16.msra.mxu0 %v5744_v48 }
 0x2e7   :  { %4363 = vmatpush1.bf16.msra.mxu1 %v5747_v44  ;;  %4323 = vmatprep.subr.bf16.mxu0 %v5752_v49 }
 0x2e8   :  { %4364 = vmatprep.subr.bf16.mxu1 %v5755_v50 }
 0x2ea   :  { %4324 = vmatpush1.bf16.msra.mxu0 %v5750_v34 }
 0x2eb   :  { %4365 = vmatpush1.bf16.msra.mxu1 %v5753_v53  ;;  %4325 = vmatprep.subr.bf16.mxu0 %v5758_v54 }
 0x2ec   :  { %4366 = vmatprep.subr.bf16.mxu1 %v5761_v47 }
 0x2ee   :  { %4326 = vmatpush1.bf16.msra.mxu0 %v5756_v46 }
 0x2ef   :  { %4367 = vmatpush1.bf16.msra.mxu1 %v5759_v55  ;;  %4327 = vmatprep.subr.bf16.mxu0 %v5764_v42 }
 0x2f0   :  { %4368 = vmatprep.subr.bf16.mxu1 %v5767_v11 }
 0x2f2   :  { %4328 = vmatpush1.bf16.msra.mxu0 %v5762_v59 }
 0x2f3   :  { %4369 = vmatpush1.bf16.msra.mxu1 %v5765_v15  ;;  %4329 = vmatprep.subr.bf16.mxu0 %v5770_v60 }
 0x2f4   :  { %4370 = vmatprep.subr.bf16.mxu1 %v5773_v57 }
 0x2f6   :  { %4330 = vmatpush1.bf16.msra.mxu0 %v5768_v62 }
 0x2f7   :  { %4371 = vmatpush1.bf16.msra.mxu1 %v5771_v29  ;;  %4331 = vmatprep.subr.bf16.mxu0 %v5776_v20 }
 0x2f8   :  { %4372 = vmatprep.subr.bf16.mxu1 %v5779_v36 }
 0x2fa   :  { %4332 = vmatpush1.bf16.msra.mxu0 %v5774_v6 }
 0x2fb   :  { %4373 = vmatpush1.bf16.msra.mxu1 %v5777_v12  ;;  %4333 = vmatprep.subr.bf16.mxu0 %v5782_v2 }
 0x2fc   :  { %4374 = vmatprep.subr.bf16.mxu1 %v5785_v58 }
 0x2fe   :  { %4334 = vmatpush1.bf16.msra.mxu0 %v5780_v7 }
 0x2ff   :  { %4375 = vmatpush1.bf16.msra.mxu1 %v5783_v25  ;;  %4335 = vmatprep.subr.bf16.mxu0 %v5788_v32 }
 0x300   :  { %4376 = vmatprep.subr.bf16.mxu1 %v5791_v13 }
 0x302   :  { %4336 = vmatpush1.bf16.msra.mxu0 %v5786_v45 }
 0x303   :  { %4377 = vmatpush1.bf16.msra.mxu1 %v5789_v5  ;;  %4337 = vmatprep.subr.bf16.mxu0 %v5794_v0 }
 0x304   :  { %4378 = vmatprep.subr.bf16.mxu1 %v5797_v8 }
 0x306   :  { %4338 = vmatpush1.bf16.msra.mxu0 %v5792_v10 }
 0x307   :  { %4379 = vmatpush1.bf16.msra.mxu1 %v5795_v43  ;;  %4339 = vmatprep.subr.bf16.mxu0 %v5800_v14 }
 0x308   :  { %4380 = vmatprep.subr.bf16.mxu1 %v5803_v51 }
 0x30a   :  { %4340 = vmatpush1.bf16.msra.mxu0 %v5798_v52 }
 0x30b   :  { %4381 = vmatpush1.bf16.msra.mxu1 %v5801_v28  ;;  %4341 = vmatprep.subr.bf16.mxu0 %v5806_v17 }
 0x30c   :  { %4382 = vmatprep.subr.bf16.mxu1 %v5809_v41 }
 0x30e   :  { %4342 = vmatpush1.bf16.msra.mxu0 %v5804_v19 }
 0x30f   :  { %4383 = vmatpush1.bf16.msra.mxu1 %v5807_v9 }
 0x311   :  { %4344 = vmatmul.mubr.bf16.vlgmr.msra.gmra.mrb[16].mxu0 %v6530_v22 }
 0x312   :  { %4385 = vmatmul.mubr.bf16.vlgmr.msra.gmra.mrb[16].mxu1 %v6532_v56 }
 0x3a4   :  { %v4263_v21 = vpop.f32.mrb[12].mxu0 }
 0x3a5   :  { %v4304_v1 = vpop.f32.mrb[12].mxu1  ;;  %v4265_v18 = vpop.f32.mrb[13].mxu0 }
 0x3a6   :  { %v4305_v3 = vadd.f32 %v4304_v1, %v4263_v21  ;;  %v4306_v4 = vpop.f32.mrb[13].mxu1  ;;  %v4267_v23 = vpop.f32.mrb[14].mxu0 }
 0x3a7   :  { %v4307_v24 = vadd.f32 %v4306_v4, %v4265_v18  ;;  %v4308_v63 = vpop.f32.mrb[14].mxu1  ;;  %v4268_v26 = vpop.f32.mrb[15].mxu0 }
 0x3a8   :  { %v4309_v27 = vpop.f32.mrb[15].mxu1  ;;  %4397 = vst [vmem:[%s6558_s8] sm:$0xff] %v4305_v3 }
 0x3a9   :  { %4398 = vst [vmem:[%s6558_s8 + $0x8] sm:$0xff] %v4307_v24 }
 0x3e4   :  { %v4345_v22 = vpop.f32.mrb[16].mxu0 }
 0x3e5   :  { %v4386_v56 = vpop.f32.mrb[16].mxu1  ;;  %v4347_v30 = vpop.f32.mrb[17].mxu0 }
 0x3e6   :  { %v4387_v31 = vadd.f32 %v4386_v56, %v4345_v22  ;;  %v4388_v33 = vpop.f32.mrb[17].mxu1  ;;  %v4349_v35 = vpop.f32.mrb[18].mxu0 }
 0x3e7   :  { %v4389_v37 = vadd.f32 %v4388_v33, %v4347_v30  ;;  %v4390_v38 = vpop.f32.mrb[18].mxu1  ;;  %v4350_v39 = vpop.f32.mrb[19].mxu0 }
 0x3e8   :  { %v4391_v40 = vpop.f32.mrb[19].mxu1  ;;  %4399 = vst [vmem:[%s6558_s8 + $0x10] sm:$0xff] %v4387_v31 }
 0x3e9   :  { %4400 = vst [vmem:[%s6558_s8 + $0x18] sm:$0xff] %v4389_v37 }
 0x3ea   :  { %4423 = vsyncpa [#allocation4], 1 }
 0x3eb   :  { %4424 = vsyncpa [#allocation6], 1 }
 0x3ec   :  { %4425 = vsyncpa [#allocation9], 1 }

</bundles_post_ra>
